<compile_context>
chip_gen: v7x
topology: tpu7x:2x2x1
jax: 0.10.0
libtpu: 0.0.40
codegen_flags: <defaults>
</compile_context>

<pallas_src>
import math
from functools import partial

import jax
import jax.numpy as jnp
from jax.experimental import pallas as pl
from jax.experimental.pallas import tpu as pltpu

# ---------------- small BERT config (consistent with the module's forward) ------------
VOCAB = 128
TYPE_VOCAB = 2
MAX_POS = 64
HIDDEN = 32
HEADS = 2
HEAD_DIM = HIDDEN // HEADS
LAYERS = 2
INTERMEDIATE = 64
LN_EPS = 1e-12


# ---------------------------- fused Pallas kernel --------------------------------------
def _layer_norm(x, g, b):
    mean = jnp.mean(x, axis=-1, keepdims=True)
    var = jnp.mean(jnp.square(x - mean), axis=-1, keepdims=True)
    return (x - mean) * jax.lax.rsqrt(var + LN_EPS) * g + b


def _gelu_exact(x):
    # exact (erf) GELU, matching HF BERT default; erf lowers to the EUP (free slot).
    return 0.5 * x * (1.0 + jax.lax.erf(x * (1.0 / math.sqrt(2.0))))


def _simcse_fused_kernel(
    emb_ref, mask_ref, eg_ref, ebeta_ref,
    wqkv_ref, bqkv_ref, wo_ref, bo_ref, ln1g_ref, ln1b_ref,
    w1_ref, b1_ref, w2_ref, b2_ref, ln2g_ref, ln2b_ref,
    pw_ref, pb_ref,
    out_ref,
    ctx_ref,
    *, batch, seq,
):
    scale = 1.0 / math.sqrt(HEAD_DIM)

    # --- embeddings LayerNorm (embedding sums are computed JAX-side) ---
    h = _layer_norm(emb_ref[...], eg_ref[...], ebeta_ref[...])        # (B*S, H)
    add_mask = mask_ref[...]                                          # (B, S), additive (0 / -1e9)

    # --- encoder layers (Python-unrolled; all intermediates stay in VMEM/vregs) ---
    for l in range(LAYERS):
        x = h

        # fused QKV projection: single (B*S, H) @ (H, 3H) matmul
        qkv = jnp.dot(x, wqkv_ref[l], preferred_element_type=jnp.float32) + bqkv_ref[l]

        # scaled-dot-product attention, unrolled over (batch, head); no HBM round
        # trips and no XLA-side split_heads/transposes.
        for b in range(batch):
            m_b = add_mask[b:b + 1, :]                                # (1, S), broadcast over rows
            r0, r1 = b * seq, (b + 1) * seq
            for hd in range(HEADS):
                c0 = hd * HEAD_DIM
                q = qkv[r0:r1, c0:c0 + HEAD_DIM]                      # (S, DH)
                k = qkv[r0:r1, HIDDEN + c0:HIDDEN + c0 + HEAD_DIM]    # (S, DH)
                v = qkv[r0:r1, 2 * HIDDEN + c0:2 * HIDDEN + c0 + HEAD_DIM]
                scores = jax.lax.dot_general(
                    q, k, (((1,), (1,)), ((), ())),
                    preferred_element_type=jnp.float32) * scale       # (S, S)
                scores = scores + m_b
                scores = scores - jnp.max(scores, axis=-1, keepdims=True)
                p = jnp.exp(scores)
                p = p * pl.reciprocal(jnp.sum(p, axis=-1, keepdims=True), approx=True)
                ctx_ref[r0:r1, c0:c0 + HEAD_DIM] = jnp.dot(
                    p, v, preferred_element_type=jnp.float32)

        # attention output projection + residual + LayerNorm (fused epilogue)
        attn_out = jnp.dot(ctx_ref[...], wo_ref[l],
                           preferred_element_type=jnp.float32) + bo_ref[l]
        h = _layer_norm(attn_out + x, ln1g_ref[l], ln1b_ref[l])

        # FFN: GELU(h @ w1 + b1) @ w2 + b2, residual + LayerNorm (fused epilogue)
        ff = _gelu_exact(jnp.dot(h, w1_ref[l], preferred_element_type=jnp.float32) + b1_ref[l])
        ff = jnp.dot(ff, w2_ref[l], preferred_element_type=jnp.float32) + b2_ref[l]
        h = _layer_norm(ff + h, ln2g_ref[l], ln2b_ref[l])

    # --- pooler: tanh(dense(CLS)) ---
    # Run the dense over the whole VMEM-resident (B*S, H) slab (one well-shaped matmul)
    # and store only each sequence's CLS row.
    pooled = jnp.tanh(jnp.dot(h, pw_ref[...], preferred_element_type=jnp.float32) + pb_ref[...])
    for b in range(batch):
        out_ref[b:b + 1, :] = pooled[b * seq:b * seq + 1, :]


# ---------------------------- parameter init (deterministic) --------------------------
def init_params(key):
    std = 0.02
    ks = iter(jax.random.split(key, 16 + LAYERS * 16))

    def nrm(shape):
        return std * jax.random.normal(next(ks), shape, dtype=jnp.float32)

    params = {
        "word_emb": nrm((VOCAB, HIDDEN)),
        "pos_emb": nrm((MAX_POS, HIDDEN)),
        "type_emb": nrm((TYPE_VOCAB, HIDDEN)),
        "emb_ln_g": jnp.ones((HIDDEN,), jnp.float32),
        "emb_ln_b": jnp.zeros((HIDDEN,), jnp.float32),
        "pool_w": nrm((HIDDEN, HIDDEN)),
        "pool_b": jnp.zeros((HIDDEN,), jnp.float32),
        "layers": [],
    }
    for _ in range(LAYERS):
        params["layers"].append({
            "wq": nrm((HIDDEN, HIDDEN)), "bq": jnp.zeros((HIDDEN,), jnp.float32),
            "wk": nrm((HIDDEN, HIDDEN)), "bk": jnp.zeros((HIDDEN,), jnp.float32),
            "wv": nrm((HIDDEN, HIDDEN)), "bv": jnp.zeros((HIDDEN,), jnp.float32),
            "wo": nrm((HIDDEN, HIDDEN)), "bo": jnp.zeros((HIDDEN,), jnp.float32),
            "ln1_g": jnp.ones((HIDDEN,), jnp.float32),
            "ln1_b": jnp.zeros((HIDDEN,), jnp.float32),
            "w1": nrm((HIDDEN, INTERMEDIATE)), "b1": jnp.zeros((INTERMEDIATE,), jnp.float32),
            "w2": nrm((INTERMEDIATE, HIDDEN)), "b2": jnp.zeros((HIDDEN,), jnp.float32),
            "ln2_g": jnp.ones((HIDDEN,), jnp.float32),
            "ln2_b": jnp.zeros((HIDDEN,), jnp.float32),
        })
    return params


# ---------------------------- SimCSE forward (pool_type='pooler') ---------------------
def simcse_forward(params, input_ids, attention_mask, token_type_ids):
    B, S = input_ids.shape

    # Embedding gathers (cheap XLA gathers; data-dependent, left outside the kernel).
    word = jnp.take(params["word_emb"], input_ids.reshape(-1), axis=0)        # (B*S, H)
    tok = jnp.take(params["type_emb"], token_type_ids.reshape(-1), axis=0)    # (B*S, H)
    pos = jnp.tile(params["pos_emb"][:S], (B, 1))                             # (B*S, H)
    emb = (word + tok + pos).astype(jnp.float32)

    # additive attention mask: 0 where attended, -1e9 where masked             (B, S)
    add_mask = (1.0 - attention_mask.astype(jnp.float32)) * -1e9

    # Stack per-layer weights on a leading layer axis; concatenate wq|wk|wv -> (H, 3H).
    layers = params["layers"]
    stack = lambda name: jnp.stack([lyr[name] for lyr in layers])             # (L, ...)
    row = lambda name: stack(name)[:, None, :]                                # (L, 1, N)
    wqkv = jnp.stack([jnp.concatenate([lyr["wq"], lyr["wk"], lyr["wv"]], axis=1)
                      for lyr in layers])                                     # (L, H, 3H)
    bqkv = jnp.stack([jnp.concatenate([lyr["bq"], lyr["bk"], lyr["bv"]])[None, :]
                      for lyr in layers])                                     # (L, 1, 3H)

    kernel = partial(_simcse_fused_kernel, batch=B, seq=S)
    return pl.pallas_call(
        kernel,
        out_shape=jax.ShapeDtypeStruct((B, HIDDEN), jnp.float32),
        scratch_shapes=[pltpu.VMEM((B * S, HIDDEN), jnp.float32)],            # attention ctx slab
    )(
        emb, add_mask,
        params["emb_ln_g"].reshape(1, HIDDEN), params["emb_ln_b"].reshape(1, HIDDEN),
        wqkv, bqkv,
        stack("wo"), row("bo"),
        row("ln1_g"), row("ln1_b"),
        stack("w1"), row("b1"),
        stack("w2"), row("b2"),
        row("ln2_g"), row("ln2_b"),
        params["pool_w"], params["pool_b"].reshape(1, HIDDEN),
    )


# ---------------------------- main -----------------------------------------------------
if __name__ == "__main__":
    B, S = 2, 8
    key = jax.random.PRNGKey(0)
    k_param, k_ids = jax.random.split(key)

    params = init_params(k_param)

    input_ids = jax.random.randint(k_ids, (B, S), 0, VOCAB, dtype=jnp.int32)
    # second sequence has 2 padding positions at the end
    attention_mask = jnp.array([[1] * S, [1] * (S - 2) + [0] * 2], dtype=jnp.int32)
    token_type_ids = jnp.zeros((B, S), dtype=jnp.int32)

    out = jax.jit(simcse_forward)(params, input_ids, attention_mask, token_type_ids)
    out = jax.block_until_ready(out)

    assert out.shape == (B, HIDDEN)
    assert bool(jnp.all(jnp.isfinite(out)))
    print("KERNEL_OK")
</pallas_src>

<mosaic_0001>
module attributes {stable_mosaic.version = 11 : i64} {
  func.func @_simcse_fused_kernel(%arg0: memref<16x32xf32, #tpu.memory_space<vmem>>, %arg1: memref<2x8xf32, #tpu.memory_space<vmem>>, %arg2: memref<1x32xf32, #tpu.memory_space<vmem>>, %arg3: memref<1x32xf32, #tpu.memory_space<vmem>>, %arg4: memref<2x32x96xf32, #tpu.memory_space<vmem>>, %arg5: memref<2x1x96xf32, #tpu.memory_space<vmem>>, %arg6: memref<2x32x32xf32, #tpu.memory_space<vmem>>, %arg7: memref<2x1x32xf32, #tpu.memory_space<vmem>>, %arg8: memref<2x1x32xf32, #tpu.memory_space<vmem>>, %arg9: memref<2x1x32xf32, #tpu.memory_space<vmem>>, %arg10: memref<2x32x64xf32, #tpu.memory_space<vmem>>, %arg11: memref<2x1x64xf32, #tpu.memory_space<vmem>>, %arg12: memref<2x64x32xf32, #tpu.memory_space<vmem>>, %arg13: memref<2x1x32xf32, #tpu.memory_space<vmem>>, %arg14: memref<2x1x32xf32, #tpu.memory_space<vmem>>, %arg15: memref<2x1x32xf32, #tpu.memory_space<vmem>>, %arg16: memref<32x32xf32, #tpu.memory_space<vmem>>, %arg17: memref<1x32xf32, #tpu.memory_space<vmem>>, %arg18: memref<2x32xf32, #tpu.memory_space<vmem>>, %arg19: memref<16x32xf32, #tpu.memory_space<vmem>>) attributes {dimension_semantics = [], scalar_prefetch = 0 : i64, scratch_operands = 1 : i64, tpu.core_type = #tpu.core_type<tc>} {
    %c0 = arith.constant 0 : index
    %c0_0 = arith.constant 0 : index
    %0 = vector.load %arg0[%c0, %c0_0] : memref<16x32xf32, #tpu.memory_space<vmem>>, vector<16x32xf32>
    %c0_1 = arith.constant 0 : index
    %c0_2 = arith.constant 0 : index
    %1 = vector.load %arg2[%c0_1, %c0_2] : memref<1x32xf32, #tpu.memory_space<vmem>>, vector<1x32xf32>
    %c0_3 = arith.constant 0 : index
    %c0_4 = arith.constant 0 : index
    %2 = vector.load %arg3[%c0_3, %c0_4] : memref<1x32xf32, #tpu.memory_space<vmem>>, vector<1x32xf32>
    %cst = arith.constant dense<0.000000e+00> : vector<16xf32>
    %3 = vector.multi_reduction <add>, %0, %cst [1] : vector<16x32xf32> to vector<16xf32>
    %4 = vector.shape_cast %3 : vector<16xf32> to vector<16x1xf32>
    %cst_5 = arith.constant 3.200000e+01 : f32
    %5 = vector.broadcast %cst_5 : f32 to vector<16x1xf32>
    %6 = arith.divf %4, %5 : vector<16x1xf32>
    %7 = vector.broadcast %6 : vector<16x1xf32> to vector<16x32xf32>
    %8 = arith.subf %0, %7 : vector<16x32xf32>
    %9 = arith.mulf %8, %8 : vector<16x32xf32>
    %cst_6 = arith.constant dense<0.000000e+00> : vector<16xf32>
    %10 = vector.multi_reduction <add>, %9, %cst_6 [1] : vector<16x32xf32> to vector<16xf32>
    %11 = vector.shape_cast %10 : vector<16xf32> to vector<16x1xf32>
    %cst_7 = arith.constant 3.200000e+01 : f32
    %12 = vector.broadcast %cst_7 : f32 to vector<16x1xf32>
    %13 = arith.divf %11, %12 : vector<16x1xf32>
    %14 = vector.broadcast %6 : vector<16x1xf32> to vector<16x32xf32>
    %15 = arith.subf %0, %14 : vector<16x32xf32>
    %cst_8 = arith.constant 9.99999996E-13 : f32
    %16 = vector.broadcast %cst_8 : f32 to vector<16x1xf32>
    %17 = arith.addf %13, %16 : vector<16x1xf32>
    %18 = math.rsqrt %17 : vector<16x1xf32>
    %19 = vector.broadcast %18 : vector<16x1xf32> to vector<16x32xf32>
    %20 = arith.mulf %15, %19 : vector<16x32xf32>
    %21 = vector.broadcast %1 : vector<1x32xf32> to vector<16x32xf32>
    %22 = arith.mulf %20, %21 : vector<16x32xf32>
    %23 = vector.broadcast %2 : vector<1x32xf32> to vector<16x32xf32>
    %24 = arith.addf %22, %23 : vector<16x32xf32>
    %c0_9 = arith.constant 0 : index
    %c0_10 = arith.constant 0 : index
    %25 = vector.load %arg1[%c0_9, %c0_10] : memref<2x8xf32, #tpu.memory_space<vmem>>, vector<2x8xf32>
    %c0_11 = arith.constant 0 : index
    %c0_12 = arith.constant 0 : index
    %c0_13 = arith.constant 0 : index
    %26 = vector.load %arg4[%c0_11, %c0_12, %c0_13] : memref<2x32x96xf32, #tpu.memory_space<vmem>>, vector<1x32x96xf32>
    %27 = vector.shape_cast %26 : vector<1x32x96xf32> to vector<32x96xf32>
    %cst_14 = arith.constant dense<0.000000e+00> : vector<16x96xf32>
    %28 = tpu.matmul %24, %27, %cst_14 {dimension_numbers = #tpu.dot_dimension_numbers<[1], [0], [0], [1], [0, 0, 1, 1], [], []>} : vector<16x32xf32>, vector<32x96xf32>, vector<16x96xf32> -> vector<16x96xf32>
    %c0_15 = arith.constant 0 : index
    %c0_16 = arith.constant 0 : index
    %c0_17 = arith.constant 0 : index
    %29 = vector.load %arg5[%c0_15, %c0_16, %c0_17] : memref<2x1x96xf32, #tpu.memory_space<vmem>>, vector<1x1x96xf32>
    %30 = vector.shape_cast %29 : vector<1x1x96xf32> to vector<1x96xf32>
    %31 = vector.broadcast %30 : vector<1x96xf32> to vector<16x96xf32>
    %32 = arith.addf %28, %31 : vector<16x96xf32>
    %33 = vector.extract_strided_slice %25 {offsets = [0, 0], sizes = [1, 8], strides = [1, 1]} : vector<2x8xf32> to vector<1x8xf32>
    %34 = vector.extract_strided_slice %32 {offsets = [0, 0], sizes = [8, 16], strides = [1, 1]} : vector<16x96xf32> to vector<8x16xf32>
    %35 = vector.extract_strided_slice %32 {offsets = [0, 32], sizes = [8, 16], strides = [1, 1]} : vector<16x96xf32> to vector<8x16xf32>
    %36 = vector.extract_strided_slice %32 {offsets = [0, 64], sizes = [8, 16], strides = [1, 1]} : vector<16x96xf32> to vector<8x16xf32>
    %cst_18 = arith.constant dense<0.000000e+00> : vector<8x8xf32>
    %37 = tpu.matmul %34, %35, %cst_18 {dimension_numbers = #tpu.dot_dimension_numbers<[1], [1], [0], [0], [0, 0, 1, 0], [], []>} : vector<8x16xf32>, vector<8x16xf32>, vector<8x8xf32> -> vector<8x8xf32>
    %cst_19 = arith.constant 2.500000e-01 : f32
    %38 = vector.broadcast %cst_19 : f32 to vector<8x8xf32>
    %39 = arith.mulf %37, %38 : vector<8x8xf32>
    %40 = vector.broadcast %33 : vector<1x8xf32> to vector<8x8xf32>
    %41 = arith.addf %39, %40 : vector<8x8xf32>
    %cst_20 = arith.constant dense<0xFF800000> : vector<8xf32>
    %42 = vector.multi_reduction <maximumf>, %41, %cst_20 [1] : vector<8x8xf32> to vector<8xf32>
    %43 = vector.shape_cast %42 : vector<8xf32> to vector<8x1xf32>
    %44 = vector.broadcast %43 : vector<8x1xf32> to vector<8x8xf32>
    %45 = arith.subf %41, %44 : vector<8x8xf32>
    %46 = math.exp %45 : vector<8x8xf32>
    %cst_21 = arith.constant dense<0.000000e+00> : vector<8xf32>
    %47 = vector.multi_reduction <add>, %46, %cst_21 [1] : vector<8x8xf32> to vector<8xf32>
    %48 = vector.shape_cast %47 : vector<8xf32> to vector<8x1xf32>
    %49 = tpu.reciprocal %48 {approx = true} : vector<8x1xf32> -> vector<8x1xf32>
    %50 = vector.broadcast %49 : vector<8x1xf32> to vector<8x8xf32>
    %51 = arith.mulf %46, %50 : vector<8x8xf32>
    %cst_22 = arith.constant dense<0.000000e+00> : vector<8x16xf32>
    %52 = tpu.matmul %51, %36, %cst_22 {dimension_numbers = #tpu.dot_dimension_numbers<[1], [0], [0], [1], [0, 0, 1, 1], [], []>} : vector<8x8xf32>, vector<8x16xf32>, vector<8x16xf32> -> vector<8x16xf32>
    %c0_23 = arith.constant 0 : index
    %c0_24 = arith.constant 0 : index
    %53 = vector.load %arg19[%c0_23, %c0_24] : memref<16x32xf32, #tpu.memory_space<vmem>>, vector<8x16xf32>
    tpu.vector_store %arg19[%c0_23, %c0_24], %52 {strides = array<i32>} : memref<16x32xf32, #tpu.memory_space<vmem>>, vector<8x16xf32>,
    %54 = vector.extract_strided_slice %32 {offsets = [0, 16], sizes = [8, 16], strides = [1, 1]} : vector<16x96xf32> to vector<8x16xf32>
    %55 = vector.extract_strided_slice %32 {offsets = [0, 48], sizes = [8, 16], strides = [1, 1]} : vector<16x96xf32> to vector<8x16xf32>
    %56 = vector.extract_strided_slice %32 {offsets = [0, 80], sizes = [8, 16], strides = [1, 1]} : vector<16x96xf32> to vector<8x16xf32>
    %cst_25 = arith.constant dense<0.000000e+00> : vector<8x8xf32>
    %57 = tpu.matmul %54, %55, %cst_25 {dimension_numbers = #tpu.dot_dimension_numbers<[1], [1], [0], [0], [0, 0, 1, 0], [], []>} : vector<8x16xf32>, vector<8x16xf32>, vector<8x8xf32> -> vector<8x8xf32>
    %cst_26 = arith.constant 2.500000e-01 : f32
    %58 = vector.broadcast %cst_26 : f32 to vector<8x8xf32>
    %59 = arith.mulf %57, %58 : vector<8x8xf32>
    %60 = vector.broadcast %33 : vector<1x8xf32> to vector<8x8xf32>
    %61 = arith.addf %59, %60 : vector<8x8xf32>
    %cst_27 = arith.constant dense<0xFF800000> : vector<8xf32>
    %62 = vector.multi_reduction <maximumf>, %61, %cst_27 [1] : vector<8x8xf32> to vector<8xf32>
    %63 = vector.shape_cast %62 : vector<8xf32> to vector<8x1xf32>
    %64 = vector.broadcast %63 : vector<8x1xf32> to vector<8x8xf32>
    %65 = arith.subf %61, %64 : vector<8x8xf32>
    %66 = math.exp %65 : vector<8x8xf32>
    %cst_28 = arith.constant dense<0.000000e+00> : vector<8xf32>
    %67 = vector.multi_reduction <add>, %66, %cst_28 [1] : vector<8x8xf32> to vector<8xf32>
    %68 = vector.shape_cast %67 : vector<8xf32> to vector<8x1xf32>
    %69 = tpu.reciprocal %68 {approx = true} : vector<8x1xf32> -> vector<8x1xf32>
    %70 = vector.broadcast %69 : vector<8x1xf32> to vector<8x8xf32>
    %71 = arith.mulf %66, %70 : vector<8x8xf32>
    %cst_29 = arith.constant dense<0.000000e+00> : vector<8x16xf32>
    %72 = tpu.matmul %71, %56, %cst_29 {dimension_numbers = #tpu.dot_dimension_numbers<[1], [0], [0], [1], [0, 0, 1, 1], [], []>} : vector<8x8xf32>, vector<8x16xf32>, vector<8x16xf32> -> vector<8x16xf32>
    %c0_30 = arith.constant 0 : index
    %c16 = arith.constant 16 : index
    %73 = vector.load %arg19[%c0_30, %c16] : memref<16x32xf32, #tpu.memory_space<vmem>>, vector<8x16xf32>
    tpu.vector_store %arg19[%c0_30, %c16], %72 {strides = array<i32>} : memref<16x32xf32, #tpu.memory_space<vmem>>, vector<8x16xf32>,
    %74 = vector.extract_strided_slice %25 {offsets = [1, 0], sizes = [1, 8], strides = [1, 1]} : vector<2x8xf32> to vector<1x8xf32>
    %75 = vector.extract_strided_slice %32 {offsets = [8, 0], sizes = [8, 16], strides = [1, 1]} : vector<16x96xf32> to vector<8x16xf32>
    %76 = vector.extract_strided_slice %32 {offsets = [8, 32], sizes = [8, 16], strides = [1, 1]} : vector<16x96xf32> to vector<8x16xf32>
    %77 = vector.extract_strided_slice %32 {offsets = [8, 64], sizes = [8, 16], strides = [1, 1]} : vector<16x96xf32> to vector<8x16xf32>
    %cst_31 = arith.constant dense<0.000000e+00> : vector<8x8xf32>
    %78 = tpu.matmul %75, %76, %cst_31 {dimension_numbers = #tpu.dot_dimension_numbers<[1], [1], [0], [0], [0, 0, 1, 0], [], []>} : vector<8x16xf32>, vector<8x16xf32>, vector<8x8xf32> -> vector<8x8xf32>
    %cst_32 = arith.constant 2.500000e-01 : f32
    %79 = vector.broadcast %cst_32 : f32 to vector<8x8xf32>
    %80 = arith.mulf %78, %79 : vector<8x8xf32>
    %81 = vector.broadcast %74 : vector<1x8xf32> to vector<8x8xf32>
    %82 = arith.addf %80, %81 : vector<8x8xf32>
    %cst_33 = arith.constant dense<0xFF800000> : vector<8xf32>
    %83 = vector.multi_reduction <maximumf>, %82, %cst_33 [1] : vector<8x8xf32> to vector<8xf32>
    %84 = vector.shape_cast %83 : vector<8xf32> to vector<8x1xf32>
    %85 = vector.broadcast %84 : vector<8x1xf32> to vector<8x8xf32>
    %86 = arith.subf %82, %85 : vector<8x8xf32>
    %87 = math.exp %86 : vector<8x8xf32>
    %cst_34 = arith.constant dense<0.000000e+00> : vector<8xf32>
    %88 = vector.multi_reduction <add>, %87, %cst_34 [1] : vector<8x8xf32> to vector<8xf32>
    %89 = vector.shape_cast %88 : vector<8xf32> to vector<8x1xf32>
    %90 = tpu.reciprocal %89 {approx = true} : vector<8x1xf32> -> vector<8x1xf32>
    %91 = vector.broadcast %90 : vector<8x1xf32> to vector<8x8xf32>
    %92 = arith.mulf %87, %91 : vector<8x8xf32>
    %cst_35 = arith.constant dense<0.000000e+00> : vector<8x16xf32>
    %93 = tpu.matmul %92, %77, %cst_35 {dimension_numbers = #tpu.dot_dimension_numbers<[1], [0], [0], [1], [0, 0, 1, 1], [], []>} : vector<8x8xf32>, vector<8x16xf32>, vector<8x16xf32> -> vector<8x16xf32>
    %c8 = arith.constant 8 : index
    %c0_36 = arith.constant 0 : index
    %94 = vector.load %arg19[%c8, %c0_36] : memref<16x32xf32, #tpu.memory_space<vmem>>, vector<8x16xf32>
    tpu.vector_store %arg19[%c8, %c0_36], %93 {strides = array<i32>} : memref<16x32xf32, #tpu.memory_space<vmem>>, vector<8x16xf32>,
    %95 = vector.extract_strided_slice %32 {offsets = [8, 16], sizes = [8, 16], strides = [1, 1]} : vector<16x96xf32> to vector<8x16xf32>
    %96 = vector.extract_strided_slice %32 {offsets = [8, 48], sizes = [8, 16], strides = [1, 1]} : vector<16x96xf32> to vector<8x16xf32>
    %97 = vector.extract_strided_slice %32 {offsets = [8, 80], sizes = [8, 16], strides = [1, 1]} : vector<16x96xf32> to vector<8x16xf32>
    %cst_37 = arith.constant dense<0.000000e+00> : vector<8x8xf32>
    %98 = tpu.matmul %95, %96, %cst_37 {dimension_numbers = #tpu.dot_dimension_numbers<[1], [1], [0], [0], [0, 0, 1, 0], [], []>} : vector<8x16xf32>, vector<8x16xf32>, vector<8x8xf32> -> vector<8x8xf32>
    %cst_38 = arith.constant 2.500000e-01 : f32
    %99 = vector.broadcast %cst_38 : f32 to vector<8x8xf32>
    %100 = arith.mulf %98, %99 : vector<8x8xf32>
    %101 = vector.broadcast %74 : vector<1x8xf32> to vector<8x8xf32>
    %102 = arith.addf %100, %101 : vector<8x8xf32>
    %cst_39 = arith.constant dense<0xFF800000> : vector<8xf32>
    %103 = vector.multi_reduction <maximumf>, %102, %cst_39 [1] : vector<8x8xf32> to vector<8xf32>
    %104 = vector.shape_cast %103 : vector<8xf32> to vector<8x1xf32>
    %105 = vector.broadcast %104 : vector<8x1xf32> to vector<8x8xf32>
    %106 = arith.subf %102, %105 : vector<8x8xf32>
    %107 = math.exp %106 : vector<8x8xf32>
    %cst_40 = arith.constant dense<0.000000e+00> : vector<8xf32>
    %108 = vector.multi_reduction <add>, %107, %cst_40 [1] : vector<8x8xf32> to vector<8xf32>
    %109 = vector.shape_cast %108 : vector<8xf32> to vector<8x1xf32>
    %110 = tpu.reciprocal %109 {approx = true} : vector<8x1xf32> -> vector<8x1xf32>
    %111 = vector.broadcast %110 : vector<8x1xf32> to vector<8x8xf32>
    %112 = arith.mulf %107, %111 : vector<8x8xf32>
    %cst_41 = arith.constant dense<0.000000e+00> : vector<8x16xf32>
    %113 = tpu.matmul %112, %97, %cst_41 {dimension_numbers = #tpu.dot_dimension_numbers<[1], [0], [0], [1], [0, 0, 1, 1], [], []>} : vector<8x8xf32>, vector<8x16xf32>, vector<8x16xf32> -> vector<8x16xf32>
    %c8_42 = arith.constant 8 : index
    %c16_43 = arith.constant 16 : index
    %114 = vector.load %arg19[%c8_42, %c16_43] : memref<16x32xf32, #tpu.memory_space<vmem>>, vector<8x16xf32>
    tpu.vector_store %arg19[%c8_42, %c16_43], %113 {strides = array<i32>} : memref<16x32xf32, #tpu.memory_space<vmem>>, vector<8x16xf32>,
    %c0_44 = arith.constant 0 : index
    %c0_45 = arith.constant 0 : index
    %115 = vector.load %arg19[%c0_44, %c0_45] : memref<16x32xf32, #tpu.memory_space<vmem>>, vector<16x32xf32>
    %c0_46 = arith.constant 0 : index
    %c0_47 = arith.constant 0 : index
    %c0_48 = arith.constant 0 : index
    %116 = vector.load %arg6[%c0_46, %c0_47, %c0_48] : memref<2x32x32xf32, #tpu.memory_space<vmem>>, vector<1x32x32xf32>
    %117 = vector.shape_cast %116 : vector<1x32x32xf32> to vector<32x32xf32>
    %cst_49 = arith.constant dense<0.000000e+00> : vector<16x32xf32>
    %118 = tpu.matmul %115, %117, %cst_49 {dimension_numbers = #tpu.dot_dimension_numbers<[1], [0], [0], [1], [0, 0, 1, 1], [], []>} : vector<16x32xf32>, vector<32x32xf32>, vector<16x32xf32> -> vector<16x32xf32>
    %c0_50 = arith.constant 0 : index
    %c0_51 = arith.constant 0 : index
    %c0_52 = arith.constant 0 : index
    %119 = vector.load %arg7[%c0_50, %c0_51, %c0_52] : memref<2x1x32xf32, #tpu.memory_space<vmem>>, vector<1x1x32xf32>
    %120 = vector.shape_cast %119 : vector<1x1x32xf32> to vector<1x32xf32>
    %121 = vector.broadcast %120 : vector<1x32xf32> to vector<16x32xf32>
    %122 = arith.addf %118, %121 : vector<16x32xf32>
    %123 = arith.addf %122, %24 : vector<16x32xf32>
    %c0_53 = arith.constant 0 : index
    %c0_54 = arith.constant 0 : index
    %c0_55 = arith.constant 0 : index
    %124 = vector.load %arg8[%c0_53, %c0_54, %c0_55] : memref<2x1x32xf32, #tpu.memory_space<vmem>>, vector<1x1x32xf32>
    %125 = vector.shape_cast %124 : vector<1x1x32xf32> to vector<1x32xf32>
    %c0_56 = arith.constant 0 : index
    %c0_57 = arith.constant 0 : index
    %c0_58 = arith.constant 0 : index
    %126 = vector.load %arg9[%c0_56, %c0_57, %c0_58] : memref<2x1x32xf32, #tpu.memory_space<vmem>>, vector<1x1x32xf32>
    %127 = vector.shape_cast %126 : vector<1x1x32xf32> to vector<1x32xf32>
    %cst_59 = arith.constant dense<0.000000e+00> : vector<16xf32>
    %128 = vector.multi_reduction <add>, %123, %cst_59 [1] : vector<16x32xf32> to vector<16xf32>
    %129 = vector.shape_cast %128 : vector<16xf32> to vector<16x1xf32>
    %cst_60 = arith.constant 3.200000e+01 : f32
    %130 = vector.broadcast %cst_60 : f32 to vector<16x1xf32>
    %131 = arith.divf %129, %130 : vector<16x1xf32>
    %132 = vector.broadcast %131 : vector<16x1xf32> to vector<16x32xf32>
    %133 = arith.subf %123, %132 : vector<16x32xf32>
    %134 = arith.mulf %133, %133 : vector<16x32xf32>
    %cst_61 = arith.constant dense<0.000000e+00> : vector<16xf32>
    %135 = vector.multi_reduction <add>, %134, %cst_61 [1] : vector<16x32xf32> to vector<16xf32>
    %136 = vector.shape_cast %135 : vector<16xf32> to vector<16x1xf32>
    %cst_62 = arith.constant 3.200000e+01 : f32
    %137 = vector.broadcast %cst_62 : f32 to vector<16x1xf32>
    %138 = arith.divf %136, %137 : vector<16x1xf32>
    %139 = vector.broadcast %131 : vector<16x1xf32> to vector<16x32xf32>
    %140 = arith.subf %123, %139 : vector<16x32xf32>
    %cst_63 = arith.constant 9.99999996E-13 : f32
    %141 = vector.broadcast %cst_63 : f32 to vector<16x1xf32>
    %142 = arith.addf %138, %141 : vector<16x1xf32>
    %143 = math.rsqrt %142 : vector<16x1xf32>
    %144 = vector.broadcast %143 : vector<16x1xf32> to vector<16x32xf32>
    %145 = arith.mulf %140, %144 : vector<16x32xf32>
    %146 = vector.broadcast %125 : vector<1x32xf32> to vector<16x32xf32>
    %147 = arith.mulf %145, %146 : vector<16x32xf32>
    %148 = vector.broadcast %127 : vector<1x32xf32> to vector<16x32xf32>
    %149 = arith.addf %147, %148 : vector<16x32xf32>
    %c0_64 = arith.constant 0 : index
    %c0_65 = arith.constant 0 : index
    %c0_66 = arith.constant 0 : index
    %150 = vector.load %arg10[%c0_64, %c0_65, %c0_66] : memref<2x32x64xf32, #tpu.memory_space<vmem>>, vector<1x32x64xf32>
    %151 = vector.shape_cast %150 : vector<1x32x64xf32> to vector<32x64xf32>
    %cst_67 = arith.constant dense<0.000000e+00> : vector<16x64xf32>
    %152 = tpu.matmul %149, %151, %cst_67 {dimension_numbers = #tpu.dot_dimension_numbers<[1], [0], [0], [1], [0, 0, 1, 1], [], []>} : vector<16x32xf32>, vector<32x64xf32>, vector<16x64xf32> -> vector<16x64xf32>
    %c0_68 = arith.constant 0 : index
    %c0_69 = arith.constant 0 : index
    %c0_70 = arith.constant 0 : index
    %153 = vector.load %arg11[%c0_68, %c0_69, %c0_70] : memref<2x1x64xf32, #tpu.memory_space<vmem>>, vector<1x1x64xf32>
    %154 = vector.shape_cast %153 : vector<1x1x64xf32> to vector<1x64xf32>
    %155 = vector.broadcast %154 : vector<1x64xf32> to vector<16x64xf32>
    %156 = arith.addf %152, %155 : vector<16x64xf32>
    %cst_71 = arith.constant 5.000000e-01 : f32
    %157 = vector.broadcast %cst_71 : f32 to vector<16x64xf32>
    %158 = arith.mulf %157, %156 : vector<16x64xf32>
    %cst_72 = arith.constant 0.707106769 : f32
    %159 = vector.broadcast %cst_72 : f32 to vector<16x64xf32>
    %160 = arith.mulf %156, %159 : vector<16x64xf32>
    %161 = math.erf %160 : vector<16x64xf32>
    %cst_73 = arith.constant 1.000000e+00 : f32
    %162 = vector.broadcast %cst_73 : f32 to vector<16x64xf32>
    %163 = arith.addf %162, %161 : vector<16x64xf32>
    %164 = arith.mulf %158, %163 : vector<16x64xf32>
    %c0_74 = arith.constant 0 : index
    %c0_75 = arith.constant 0 : index
    %c0_76 = arith.constant 0 : index
    %165 = vector.load %arg12[%c0_74, %c0_75, %c0_76] : memref<2x64x32xf32, #tpu.memory_space<vmem>>, vector<1x64x32xf32>
    %166 = vector.shape_cast %165 : vector<1x64x32xf32> to vector<64x32xf32>
    %cst_77 = arith.constant dense<0.000000e+00> : vector<16x32xf32>
    %167 = tpu.matmul %164, %166, %cst_77 {dimension_numbers = #tpu.dot_dimension_numbers<[1], [0], [0], [1], [0, 0, 1, 1], [], []>} : vector<16x64xf32>, vector<64x32xf32>, vector<16x32xf32> -> vector<16x32xf32>
    %c0_78 = arith.constant 0 : index
    %c0_79 = arith.constant 0 : index
    %c0_80 = arith.constant 0 : index
    %168 = vector.load %arg13[%c0_78, %c0_79, %c0_80] : memref<2x1x32xf32, #tpu.memory_space<vmem>>, vector<1x1x32xf32>
    %169 = vector.shape_cast %168 : vector<1x1x32xf32> to vector<1x32xf32>
    %170 = vector.broadcast %169 : vector<1x32xf32> to vector<16x32xf32>
    %171 = arith.addf %167, %170 : vector<16x32xf32>
    %172 = arith.addf %171, %149 : vector<16x32xf32>
    %c0_81 = arith.constant 0 : index
    %c0_82 = arith.constant 0 : index
    %c0_83 = arith.constant 0 : index
    %173 = vector.load %arg14[%c0_81, %c0_82, %c0_83] : memref<2x1x32xf32, #tpu.memory_space<vmem>>, vector<1x1x32xf32>
    %174 = vector.shape_cast %173 : vector<1x1x32xf32> to vector<1x32xf32>
    %c0_84 = arith.constant 0 : index
    %c0_85 = arith.constant 0 : index
    %c0_86 = arith.constant 0 : index
    %175 = vector.load %arg15[%c0_84, %c0_85, %c0_86] : memref<2x1x32xf32, #tpu.memory_space<vmem>>, vector<1x1x32xf32>
    %176 = vector.shape_cast %175 : vector<1x1x32xf32> to vector<1x32xf32>
    %cst_87 = arith.constant dense<0.000000e+00> : vector<16xf32>
    %177 = vector.multi_reduction <add>, %172, %cst_87 [1] : vector<16x32xf32> to vector<16xf32>
    %178 = vector.shape_cast %177 : vector<16xf32> to vector<16x1xf32>
    %cst_88 = arith.constant 3.200000e+01 : f32
    %179 = vector.broadcast %cst_88 : f32 to vector<16x1xf32>
    %180 = arith.divf %178, %179 : vector<16x1xf32>
    %181 = vector.broadcast %180 : vector<16x1xf32> to vector<16x32xf32>
    %182 = arith.subf %172, %181 : vector<16x32xf32>
    %183 = arith.mulf %182, %182 : vector<16x32xf32>
    %cst_89 = arith.constant dense<0.000000e+00> : vector<16xf32>
    %184 = vector.multi_reduction <add>, %183, %cst_89 [1] : vector<16x32xf32> to vector<16xf32>
    %185 = vector.shape_cast %184 : vector<16xf32> to vector<16x1xf32>
    %cst_90 = arith.constant 3.200000e+01 : f32
    %186 = vector.broadcast %cst_90 : f32 to vector<16x1xf32>
    %187 = arith.divf %185, %186 : vector<16x1xf32>
    %188 = vector.broadcast %180 : vector<16x1xf32> to vector<16x32xf32>
    %189 = arith.subf %172, %188 : vector<16x32xf32>
    %cst_91 = arith.constant 9.99999996E-13 : f32
    %190 = vector.broadcast %cst_91 : f32 to vector<16x1xf32>
    %191 = arith.addf %187, %190 : vector<16x1xf32>
    %192 = math.rsqrt %191 : vector<16x1xf32>
    %193 = vector.broadcast %192 : vector<16x1xf32> to vector<16x32xf32>
    %194 = arith.mulf %189, %193 : vector<16x32xf32>
    %195 = vector.broadcast %174 : vector<1x32xf32> to vector<16x32xf32>
    %196 = arith.mulf %194, %195 : vector<16x32xf32>
    %197 = vector.broadcast %176 : vector<1x32xf32> to vector<16x32xf32>
    %198 = arith.addf %196, %197 : vector<16x32xf32>
    %c1 = arith.constant 1 : index
    %c0_92 = arith.constant 0 : index
    %c0_93 = arith.constant 0 : index
    %199 = vector.load %arg4[%c1, %c0_92, %c0_93] : memref<2x32x96xf32, #tpu.memory_space<vmem>>, vector<1x32x96xf32>
    %200 = vector.shape_cast %199 : vector<1x32x96xf32> to vector<32x96xf32>
    %cst_94 = arith.constant dense<0.000000e+00> : vector<16x96xf32>
    %201 = tpu.matmul %198, %200, %cst_94 {dimension_numbers = #tpu.dot_dimension_numbers<[1], [0], [0], [1], [0, 0, 1, 1], [], []>} : vector<16x32xf32>, vector<32x96xf32>, vector<16x96xf32> -> vector<16x96xf32>
    %c1_95 = arith.constant 1 : index
    %c0_96 = arith.constant 0 : index
    %c0_97 = arith.constant 0 : index
    %202 = vector.load %arg5[%c1_95, %c0_96, %c0_97] : memref<2x1x96xf32, #tpu.memory_space<vmem>>, vector<1x1x96xf32>
    %203 = vector.shape_cast %202 : vector<1x1x96xf32> to vector<1x96xf32>
    %204 = vector.broadcast %203 : vector<1x96xf32> to vector<16x96xf32>
    %205 = arith.addf %201, %204 : vector<16x96xf32>
    %206 = vector.extract_strided_slice %25 {offsets = [0, 0], sizes = [1, 8], strides = [1, 1]} : vector<2x8xf32> to vector<1x8xf32>
    %207 = vector.extract_strided_slice %205 {offsets = [0, 0], sizes = [8, 16], strides = [1, 1]} : vector<16x96xf32> to vector<8x16xf32>
    %208 = vector.extract_strided_slice %205 {offsets = [0, 32], sizes = [8, 16], strides = [1, 1]} : vector<16x96xf32> to vector<8x16xf32>
    %209 = vector.extract_strided_slice %205 {offsets = [0, 64], sizes = [8, 16], strides = [1, 1]} : vector<16x96xf32> to vector<8x16xf32>
    %cst_98 = arith.constant dense<0.000000e+00> : vector<8x8xf32>
    %210 = tpu.matmul %207, %208, %cst_98 {dimension_numbers = #tpu.dot_dimension_numbers<[1], [1], [0], [0], [0, 0, 1, 0], [], []>} : vector<8x16xf32>, vector<8x16xf32>, vector<8x8xf32> -> vector<8x8xf32>
    %cst_99 = arith.constant 2.500000e-01 : f32
    %211 = vector.broadcast %cst_99 : f32 to vector<8x8xf32>
    %212 = arith.mulf %210, %211 : vector<8x8xf32>
    %213 = vector.broadcast %206 : vector<1x8xf32> to vector<8x8xf32>
    %214 = arith.addf %212, %213 : vector<8x8xf32>
    %cst_100 = arith.constant dense<0xFF800000> : vector<8xf32>
    %215 = vector.multi_reduction <maximumf>, %214, %cst_100 [1] : vector<8x8xf32> to vector<8xf32>
    %216 = vector.shape_cast %215 : vector<8xf32> to vector<8x1xf32>
    %217 = vector.broadcast %216 : vector<8x1xf32> to vector<8x8xf32>
    %218 = arith.subf %214, %217 : vector<8x8xf32>
    %219 = math.exp %218 : vector<8x8xf32>
    %cst_101 = arith.constant dense<0.000000e+00> : vector<8xf32>
    %220 = vector.multi_reduction <add>, %219, %cst_101 [1] : vector<8x8xf32> to vector<8xf32>
    %221 = vector.shape_cast %220 : vector<8xf32> to vector<8x1xf32>
    %222 = tpu.reciprocal %221 {approx = true} : vector<8x1xf32> -> vector<8x1xf32>
    %223 = vector.broadcast %222 : vector<8x1xf32> to vector<8x8xf32>
    %224 = arith.mulf %219, %223 : vector<8x8xf32>
    %cst_102 = arith.constant dense<0.000000e+00> : vector<8x16xf32>
    %225 = tpu.matmul %224, %209, %cst_102 {dimension_numbers = #tpu.dot_dimension_numbers<[1], [0], [0], [1], [0, 0, 1, 1], [], []>} : vector<8x8xf32>, vector<8x16xf32>, vector<8x16xf32> -> vector<8x16xf32>
    %c0_103 = arith.constant 0 : index
    %c0_104 = arith.constant 0 : index
    %226 = vector.load %arg19[%c0_103, %c0_104] : memref<16x32xf32, #tpu.memory_space<vmem>>, vector<8x16xf32>
    tpu.vector_store %arg19[%c0_103, %c0_104], %225 {strides = array<i32>} : memref<16x32xf32, #tpu.memory_space<vmem>>, vector<8x16xf32>,
    %227 = vector.extract_strided_slice %205 {offsets = [0, 16], sizes = [8, 16], strides = [1, 1]} : vector<16x96xf32> to vector<8x16xf32>
    %228 = vector.extract_strided_slice %205 {offsets = [0, 48], sizes = [8, 16], strides = [1, 1]} : vector<16x96xf32> to vector<8x16xf32>
    %229 = vector.extract_strided_slice %205 {offsets = [0, 80], sizes = [8, 16], strides = [1, 1]} : vector<16x96xf32> to vector<8x16xf32>
    %cst_105 = arith.constant dense<0.000000e+00> : vector<8x8xf32>
    %230 = tpu.matmul %227, %228, %cst_105 {dimension_numbers = #tpu.dot_dimension_numbers<[1], [1], [0], [0], [0, 0, 1, 0], [], []>} : vector<8x16xf32>, vector<8x16xf32>, vector<8x8xf32> -> vector<8x8xf32>
    %cst_106 = arith.constant 2.500000e-01 : f32
    %231 = vector.broadcast %cst_106 : f32 to vector<8x8xf32>
    %232 = arith.mulf %230, %231 : vector<8x8xf32>
    %233 = vector.broadcast %206 : vector<1x8xf32> to vector<8x8xf32>
    %234 = arith.addf %232, %233 : vector<8x8xf32>
    %cst_107 = arith.constant dense<0xFF800000> : vector<8xf32>
    %235 = vector.multi_reduction <maximumf>, %234, %cst_107 [1] : vector<8x8xf32> to vector<8xf32>
    %236 = vector.shape_cast %235 : vector<8xf32> to vector<8x1xf32>
    %237 = vector.broadcast %236 : vector<8x1xf32> to vector<8x8xf32>
    %238 = arith.subf %234, %237 : vector<8x8xf32>
    %239 = math.exp %238 : vector<8x8xf32>
    %cst_108 = arith.constant dense<0.000000e+00> : vector<8xf32>
    %240 = vector.multi_reduction <add>, %239, %cst_108 [1] : vector<8x8xf32> to vector<8xf32>
    %241 = vector.shape_cast %240 : vector<8xf32> to vector<8x1xf32>
    %242 = tpu.reciprocal %241 {approx = true} : vector<8x1xf32> -> vector<8x1xf32>
    %243 = vector.broadcast %242 : vector<8x1xf32> to vector<8x8xf32>
    %244 = arith.mulf %239, %243 : vector<8x8xf32>
    %cst_109 = arith.constant dense<0.000000e+00> : vector<8x16xf32>
    %245 = tpu.matmul %244, %229, %cst_109 {dimension_numbers = #tpu.dot_dimension_numbers<[1], [0], [0], [1], [0, 0, 1, 1], [], []>} : vector<8x8xf32>, vector<8x16xf32>, vector<8x16xf32> -> vector<8x16xf32>
    %c0_110 = arith.constant 0 : index
    %c16_111 = arith.constant 16 : index
    %246 = vector.load %arg19[%c0_110, %c16_111] : memref<16x32xf32, #tpu.memory_space<vmem>>, vector<8x16xf32>
    tpu.vector_store %arg19[%c0_110, %c16_111], %245 {strides = array<i32>} : memref<16x32xf32, #tpu.memory_space<vmem>>, vector<8x16xf32>,
    %247 = vector.extract_strided_slice %25 {offsets = [1, 0], sizes = [1, 8], strides = [1, 1]} : vector<2x8xf32> to vector<1x8xf32>
    %248 = vector.extract_strided_slice %205 {offsets = [8, 0], sizes = [8, 16], strides = [1, 1]} : vector<16x96xf32> to vector<8x16xf32>
    %249 = vector.extract_strided_slice %205 {offsets = [8, 32], sizes = [8, 16], strides = [1, 1]} : vector<16x96xf32> to vector<8x16xf32>
    %250 = vector.extract_strided_slice %205 {offsets = [8, 64], sizes = [8, 16], strides = [1, 1]} : vector<16x96xf32> to vector<8x16xf32>
    %cst_112 = arith.constant dense<0.000000e+00> : vector<8x8xf32>
    %251 = tpu.matmul %248, %249, %cst_112 {dimension_numbers = #tpu.dot_dimension_numbers<[1], [1], [0], [0], [0, 0, 1, 0], [], []>} : vector<8x16xf32>, vector<8x16xf32>, vector<8x8xf32> -> vector<8x8xf32>
    %cst_113 = arith.constant 2.500000e-01 : f32
    %252 = vector.broadcast %cst_113 : f32 to vector<8x8xf32>
    %253 = arith.mulf %251, %252 : vector<8x8xf32>
    %254 = vector.broadcast %247 : vector<1x8xf32> to vector<8x8xf32>
    %255 = arith.addf %253, %254 : vector<8x8xf32>
    %cst_114 = arith.constant dense<0xFF800000> : vector<8xf32>
    %256 = vector.multi_reduction <maximumf>, %255, %cst_114 [1] : vector<8x8xf32> to vector<8xf32>
    %257 = vector.shape_cast %256 : vector<8xf32> to vector<8x1xf32>
    %258 = vector.broadcast %257 : vector<8x1xf32> to vector<8x8xf32>
    %259 = arith.subf %255, %258 : vector<8x8xf32>
    %260 = math.exp %259 : vector<8x8xf32>
    %cst_115 = arith.constant dense<0.000000e+00> : vector<8xf32>
    %261 = vector.multi_reduction <add>, %260, %cst_115 [1] : vector<8x8xf32> to vector<8xf32>
    %262 = vector.shape_cast %261 : vector<8xf32> to vector<8x1xf32>
    %263 = tpu.reciprocal %262 {approx = true} : vector<8x1xf32> -> vector<8x1xf32>
    %264 = vector.broadcast %263 : vector<8x1xf32> to vector<8x8xf32>
    %265 = arith.mulf %260, %264 : vector<8x8xf32>
    %cst_116 = arith.constant dense<0.000000e+00> : vector<8x16xf32>
    %266 = tpu.matmul %265, %250, %cst_116 {dimension_numbers = #tpu.dot_dimension_numbers<[1], [0], [0], [1], [0, 0, 1, 1], [], []>} : vector<8x8xf32>, vector<8x16xf32>, vector<8x16xf32> -> vector<8x16xf32>
    %c8_117 = arith.constant 8 : index
    %c0_118 = arith.constant 0 : index
    %267 = vector.load %arg19[%c8_117, %c0_118] : memref<16x32xf32, #tpu.memory_space<vmem>>, vector<8x16xf32>
    tpu.vector_store %arg19[%c8_117, %c0_118], %266 {strides = array<i32>} : memref<16x32xf32, #tpu.memory_space<vmem>>, vector<8x16xf32>,
    %268 = vector.extract_strided_slice %205 {offsets = [8, 16], sizes = [8, 16], strides = [1, 1]} : vector<16x96xf32> to vector<8x16xf32>
    %269 = vector.extract_strided_slice %205 {offsets = [8, 48], sizes = [8, 16], strides = [1, 1]} : vector<16x96xf32> to vector<8x16xf32>
    %270 = vector.extract_strided_slice %205 {offsets = [8, 80], sizes = [8, 16], strides = [1, 1]} : vector<16x96xf32> to vector<8x16xf32>
    %cst_119 = arith.constant dense<0.000000e+00> : vector<8x8xf32>
    %271 = tpu.matmul %268, %269, %cst_119 {dimension_numbers = #tpu.dot_dimension_numbers<[1], [1], [0], [0], [0, 0, 1, 0], [], []>} : vector<8x16xf32>, vector<8x16xf32>, vector<8x8xf32> -> vector<8x8xf32>
    %cst_120 = arith.constant 2.500000e-01 : f32
    %272 = vector.broadcast %cst_120 : f32 to vector<8x8xf32>
    %273 = arith.mulf %271, %272 : vector<8x8xf32>
    %274 = vector.broadcast %247 : vector<1x8xf32> to vector<8x8xf32>
    %275 = arith.addf %273, %274 : vector<8x8xf32>
    %cst_121 = arith.constant dense<0xFF800000> : vector<8xf32>
    %276 = vector.multi_reduction <maximumf>, %275, %cst_121 [1] : vector<8x8xf32> to vector<8xf32>
    %277 = vector.shape_cast %276 : vector<8xf32> to vector<8x1xf32>
    %278 = vector.broadcast %277 : vector<8x1xf32> to vector<8x8xf32>
    %279 = arith.subf %275, %278 : vector<8x8xf32>
    %280 = math.exp %279 : vector<8x8xf32>
    %cst_122 = arith.constant dense<0.000000e+00> : vector<8xf32>
    %281 = vector.multi_reduction <add>, %280, %cst_122 [1] : vector<8x8xf32> to vector<8xf32>
    %282 = vector.shape_cast %281 : vector<8xf32> to vector<8x1xf32>
    %283 = tpu.reciprocal %282 {approx = true} : vector<8x1xf32> -> vector<8x1xf32>
    %284 = vector.broadcast %283 : vector<8x1xf32> to vector<8x8xf32>
    %285 = arith.mulf %280, %284 : vector<8x8xf32>
    %cst_123 = arith.constant dense<0.000000e+00> : vector<8x16xf32>
    %286 = tpu.matmul %285, %270, %cst_123 {dimension_numbers = #tpu.dot_dimension_numbers<[1], [0], [0], [1], [0, 0, 1, 1], [], []>} : vector<8x8xf32>, vector<8x16xf32>, vector<8x16xf32> -> vector<8x16xf32>
    %c8_124 = arith.constant 8 : index
    %c16_125 = arith.constant 16 : index
    %287 = vector.load %arg19[%c8_124, %c16_125] : memref<16x32xf32, #tpu.memory_space<vmem>>, vector<8x16xf32>
    tpu.vector_store %arg19[%c8_124, %c16_125], %286 {strides = array<i32>} : memref<16x32xf32, #tpu.memory_space<vmem>>, vector<8x16xf32>,
    %c0_126 = arith.constant 0 : index
    %c0_127 = arith.constant 0 : index
    %288 = vector.load %arg19[%c0_126, %c0_127] : memref<16x32xf32, #tpu.memory_space<vmem>>, vector<16x32xf32>
    %c1_128 = arith.constant 1 : index
    %c0_129 = arith.constant 0 : index
    %c0_130 = arith.constant 0 : index
    %289 = vector.load %arg6[%c1_128, %c0_129, %c0_130] : memref<2x32x32xf32, #tpu.memory_space<vmem>>, vector<1x32x32xf32>
    %290 = vector.shape_cast %289 : vector<1x32x32xf32> to vector<32x32xf32>
    %cst_131 = arith.constant dense<0.000000e+00> : vector<16x32xf32>
    %291 = tpu.matmul %288, %290, %cst_131 {dimension_numbers = #tpu.dot_dimension_numbers<[1], [0], [0], [1], [0, 0, 1, 1], [], []>} : vector<16x32xf32>, vector<32x32xf32>, vector<16x32xf32> -> vector<16x32xf32>
    %c1_132 = arith.constant 1 : index
    %c0_133 = arith.constant 0 : index
    %c0_134 = arith.constant 0 : index
    %292 = vector.load %arg7[%c1_132, %c0_133, %c0_134] : memref<2x1x32xf32, #tpu.memory_space<vmem>>, vector<1x1x32xf32>
    %293 = vector.shape_cast %292 : vector<1x1x32xf32> to vector<1x32xf32>
    %294 = vector.broadcast %293 : vector<1x32xf32> to vector<16x32xf32>
    %295 = arith.addf %291, %294 : vector<16x32xf32>
    %296 = arith.addf %295, %198 : vector<16x32xf32>
    %c1_135 = arith.constant 1 : index
    %c0_136 = arith.constant 0 : index
    %c0_137 = arith.constant 0 : index
    %297 = vector.load %arg8[%c1_135, %c0_136, %c0_137] : memref<2x1x32xf32, #tpu.memory_space<vmem>>, vector<1x1x32xf32>
    %298 = vector.shape_cast %297 : vector<1x1x32xf32> to vector<1x32xf32>
    %c1_138 = arith.constant 1 : index
    %c0_139 = arith.constant 0 : index
    %c0_140 = arith.constant 0 : index
    %299 = vector.load %arg9[%c1_138, %c0_139, %c0_140] : memref<2x1x32xf32, #tpu.memory_space<vmem>>, vector<1x1x32xf32>
    %300 = vector.shape_cast %299 : vector<1x1x32xf32> to vector<1x32xf32>
    %cst_141 = arith.constant dense<0.000000e+00> : vector<16xf32>
    %301 = vector.multi_reduction <add>, %296, %cst_141 [1] : vector<16x32xf32> to vector<16xf32>
    %302 = vector.shape_cast %301 : vector<16xf32> to vector<16x1xf32>
    %cst_142 = arith.constant 3.200000e+01 : f32
    %303 = vector.broadcast %cst_142 : f32 to vector<16x1xf32>
    %304 = arith.divf %302, %303 : vector<16x1xf32>
    %305 = vector.broadcast %304 : vector<16x1xf32> to vector<16x32xf32>
    %306 = arith.subf %296, %305 : vector<16x32xf32>
    %307 = arith.mulf %306, %306 : vector<16x32xf32>
    %cst_143 = arith.constant dense<0.000000e+00> : vector<16xf32>
    %308 = vector.multi_reduction <add>, %307, %cst_143 [1] : vector<16x32xf32> to vector<16xf32>
    %309 = vector.shape_cast %308 : vector<16xf32> to vector<16x1xf32>
    %cst_144 = arith.constant 3.200000e+01 : f32
    %310 = vector.broadcast %cst_144 : f32 to vector<16x1xf32>
    %311 = arith.divf %309, %310 : vector<16x1xf32>
    %312 = vector.broadcast %304 : vector<16x1xf32> to vector<16x32xf32>
    %313 = arith.subf %296, %312 : vector<16x32xf32>
    %cst_145 = arith.constant 9.99999996E-13 : f32
    %314 = vector.broadcast %cst_145 : f32 to vector<16x1xf32>
    %315 = arith.addf %311, %314 : vector<16x1xf32>
    %316 = math.rsqrt %315 : vector<16x1xf32>
    %317 = vector.broadcast %316 : vector<16x1xf32> to vector<16x32xf32>
    %318 = arith.mulf %313, %317 : vector<16x32xf32>
    %319 = vector.broadcast %298 : vector<1x32xf32> to vector<16x32xf32>
    %320 = arith.mulf %318, %319 : vector<16x32xf32>
    %321 = vector.broadcast %300 : vector<1x32xf32> to vector<16x32xf32>
    %322 = arith.addf %320, %321 : vector<16x32xf32>
    %c1_146 = arith.constant 1 : index
    %c0_147 = arith.constant 0 : index
    %c0_148 = arith.constant 0 : index
    %323 = vector.load %arg10[%c1_146, %c0_147, %c0_148] : memref<2x32x64xf32, #tpu.memory_space<vmem>>, vector<1x32x64xf32>
    %324 = vector.shape_cast %323 : vector<1x32x64xf32> to vector<32x64xf32>
    %cst_149 = arith.constant dense<0.000000e+00> : vector<16x64xf32>
    %325 = tpu.matmul %322, %324, %cst_149 {dimension_numbers = #tpu.dot_dimension_numbers<[1], [0], [0], [1], [0, 0, 1, 1], [], []>} : vector<16x32xf32>, vector<32x64xf32>, vector<16x64xf32> -> vector<16x64xf32>
    %c1_150 = arith.constant 1 : index
    %c0_151 = arith.constant 0 : index
    %c0_152 = arith.constant 0 : index
    %326 = vector.load %arg11[%c1_150, %c0_151, %c0_152] : memref<2x1x64xf32, #tpu.memory_space<vmem>>, vector<1x1x64xf32>
    %327 = vector.shape_cast %326 : vector<1x1x64xf32> to vector<1x64xf32>
    %328 = vector.broadcast %327 : vector<1x64xf32> to vector<16x64xf32>
    %329 = arith.addf %325, %328 : vector<16x64xf32>
    %cst_153 = arith.constant 5.000000e-01 : f32
    %330 = vector.broadcast %cst_153 : f32 to vector<16x64xf32>
    %331 = arith.mulf %330, %329 : vector<16x64xf32>
    %cst_154 = arith.constant 0.707106769 : f32
    %332 = vector.broadcast %cst_154 : f32 to vector<16x64xf32>
    %333 = arith.mulf %329, %332 : vector<16x64xf32>
    %334 = math.erf %333 : vector<16x64xf32>
    %cst_155 = arith.constant 1.000000e+00 : f32
    %335 = vector.broadcast %cst_155 : f32 to vector<16x64xf32>
    %336 = arith.addf %335, %334 : vector<16x64xf32>
    %337 = arith.mulf %331, %336 : vector<16x64xf32>
    %c1_156 = arith.constant 1 : index
    %c0_157 = arith.constant 0 : index
    %c0_158 = arith.constant 0 : index
    %338 = vector.load %arg12[%c1_156, %c0_157, %c0_158] : memref<2x64x32xf32, #tpu.memory_space<vmem>>, vector<1x64x32xf32>
    %339 = vector.shape_cast %338 : vector<1x64x32xf32> to vector<64x32xf32>
    %cst_159 = arith.constant dense<0.000000e+00> : vector<16x32xf32>
    %340 = tpu.matmul %337, %339, %cst_159 {dimension_numbers = #tpu.dot_dimension_numbers<[1], [0], [0], [1], [0, 0, 1, 1], [], []>} : vector<16x64xf32>, vector<64x32xf32>, vector<16x32xf32> -> vector<16x32xf32>
    %c1_160 = arith.constant 1 : index
    %c0_161 = arith.constant 0 : index
    %c0_162 = arith.constant 0 : index
    %341 = vector.load %arg13[%c1_160, %c0_161, %c0_162] : memref<2x1x32xf32, #tpu.memory_space<vmem>>, vector<1x1x32xf32>
    %342 = vector.shape_cast %341 : vector<1x1x32xf32> to vector<1x32xf32>
    %343 = vector.broadcast %342 : vector<1x32xf32> to vector<16x32xf32>
    %344 = arith.addf %340, %343 : vector<16x32xf32>
    %345 = arith.addf %344, %322 : vector<16x32xf32>
    %c1_163 = arith.constant 1 : index
    %c0_164 = arith.constant 0 : index
    %c0_165 = arith.constant 0 : index
    %346 = vector.load %arg14[%c1_163, %c0_164, %c0_165] : memref<2x1x32xf32, #tpu.memory_space<vmem>>, vector<1x1x32xf32>
    %347 = vector.shape_cast %346 : vector<1x1x32xf32> to vector<1x32xf32>
    %c1_166 = arith.constant 1 : index
    %c0_167 = arith.constant 0 : index
    %c0_168 = arith.constant 0 : index
    %348 = vector.load %arg15[%c1_166, %c0_167, %c0_168] : memref<2x1x32xf32, #tpu.memory_space<vmem>>, vector<1x1x32xf32>
    %349 = vector.shape_cast %348 : vector<1x1x32xf32> to vector<1x32xf32>
    %cst_169 = arith.constant dense<0.000000e+00> : vector<16xf32>
    %350 = vector.multi_reduction <add>, %345, %cst_169 [1] : vector<16x32xf32> to vector<16xf32>
    %351 = vector.shape_cast %350 : vector<16xf32> to vector<16x1xf32>
    %cst_170 = arith.constant 3.200000e+01 : f32
    %352 = vector.broadcast %cst_170 : f32 to vector<16x1xf32>
    %353 = arith.divf %351, %352 : vector<16x1xf32>
    %354 = vector.broadcast %353 : vector<16x1xf32> to vector<16x32xf32>
    %355 = arith.subf %345, %354 : vector<16x32xf32>
    %356 = arith.mulf %355, %355 : vector<16x32xf32>
    %cst_171 = arith.constant dense<0.000000e+00> : vector<16xf32>
    %357 = vector.multi_reduction <add>, %356, %cst_171 [1] : vector<16x32xf32> to vector<16xf32>
    %358 = vector.shape_cast %357 : vector<16xf32> to vector<16x1xf32>
    %cst_172 = arith.constant 3.200000e+01 : f32
    %359 = vector.broadcast %cst_172 : f32 to vector<16x1xf32>
    %360 = arith.divf %358, %359 : vector<16x1xf32>
    %361 = vector.broadcast %353 : vector<16x1xf32> to vector<16x32xf32>
    %362 = arith.subf %345, %361 : vector<16x32xf32>
    %cst_173 = arith.constant 9.99999996E-13 : f32
    %363 = vector.broadcast %cst_173 : f32 to vector<16x1xf32>
    %364 = arith.addf %360, %363 : vector<16x1xf32>
    %365 = math.rsqrt %364 : vector<16x1xf32>
    %366 = vector.broadcast %365 : vector<16x1xf32> to vector<16x32xf32>
    %367 = arith.mulf %362, %366 : vector<16x32xf32>
    %368 = vector.broadcast %347 : vector<1x32xf32> to vector<16x32xf32>
    %369 = arith.mulf %367, %368 : vector<16x32xf32>
    %370 = vector.broadcast %349 : vector<1x32xf32> to vector<16x32xf32>
    %371 = arith.addf %369, %370 : vector<16x32xf32>
    %c0_174 = arith.constant 0 : index
    %c0_175 = arith.constant 0 : index
    %372 = vector.load %arg16[%c0_174, %c0_175] : memref<32x32xf32, #tpu.memory_space<vmem>>, vector<32x32xf32>
    %cst_176 = arith.constant dense<0.000000e+00> : vector<16x32xf32>
    %373 = tpu.matmul %371, %372, %cst_176 {dimension_numbers = #tpu.dot_dimension_numbers<[1], [0], [0], [1], [0, 0, 1, 1], [], []>} : vector<16x32xf32>, vector<32x32xf32>, vector<16x32xf32> -> vector<16x32xf32>
    %c0_177 = arith.constant 0 : index
    %c0_178 = arith.constant 0 : index
    %374 = vector.load %arg17[%c0_177, %c0_178] : memref<1x32xf32, #tpu.memory_space<vmem>>, vector<1x32xf32>
    %375 = vector.broadcast %374 : vector<1x32xf32> to vector<16x32xf32>
    %376 = arith.addf %373, %375 : vector<16x32xf32>
    %377 = math.tanh %376 : vector<16x32xf32>
    %378 = vector.extract_strided_slice %377 {offsets = [0, 0], sizes = [1, 32], strides = [1, 1]} : vector<16x32xf32> to vector<1x32xf32>
    %c0_179 = arith.constant 0 : index
    %c0_180 = arith.constant 0 : index
    %379 = vector.load %arg18[%c0_179, %c0_180] : memref<2x32xf32, #tpu.memory_space<vmem>>, vector<1x32xf32>
    tpu.vector_store %arg18[%c0_179, %c0_180], %378 {strides = array<i32>} : memref<2x32xf32, #tpu.memory_space<vmem>>, vector<1x32xf32>,
    %380 = vector.extract_strided_slice %377 {offsets = [8, 0], sizes = [1, 32], strides = [1, 1]} : vector<16x32xf32> to vector<1x32xf32>
    %c1_181 = arith.constant 1 : index
    %c0_182 = arith.constant 0 : index
    %381 = vector.load %arg18[%c1_181, %c0_182] : memref<2x32xf32, #tpu.memory_space<vmem>>, vector<1x32xf32>
    tpu.vector_store %arg18[%c1_181, %c0_182], %380 {strides = array<i32>} : memref<2x32xf32, #tpu.memory_space<vmem>>, vector<1x32xf32>,
    return
  }
}

</mosaic_0001>

<bundles_post_ra>
// kernel: simcse_forward.1
= control target key start
LH: loop header
LB: loop body
LE: loop exit
PB: predicated region body
PF: predicated region fallthrough
CT: control target
= control target key end

     0   :  { %s3647_s0 = inlined_call_operand.vmem [shape: f32[16,32], index: 0, kind: input, shape index: {}]   ;;  %s3648_s1 = inlined_call_operand.vmem [shape: f32[2,8], index: 1, kind: input, shape index: {}]   ;;  %s3649_s2 = inlined_call_operand.vmem [shape: f32[1,32], index: 2, kind: input, shape index: {}]   ;;  %s3650_s3 = inlined_call_operand.vmem [shape: f32[1,32], index: 3, kind: input, shape index: {}]   ;;  %s3651_s4 = inlined_call_operand.vmem [shape: f32[2,32,96], index: 4, kind: input, shape index: {}]   ;;  %s3652_s5 = inlined_call_operand.vmem [shape: f32[2,1,96], index: 5, kind: input, shape index: {}]   ;;  %s3653_s6 = inlined_call_operand.vmem [shape: f32[2,32,32], index: 6, kind: input, shape index: {}]   ;;  %s3654_s7 = inlined_call_operand.vmem [shape: f32[2,1,32], index: 7, kind: input, shape index: {}]   ;;  %s3655_s8 = inlined_call_operand.vmem [shape: f32[2,1,32], index: 8, kind: input, shape index: {}]   ;;  %s3656_s9 = inlined_call_operand.vmem [shape: f32[2,1,32], index: 9, kind: input, shape index: {}]   ;;  %s3657_s10 = inlined_call_operand.vmem [shape: f32[2,32,64], index: 10, kind: input, shape index: {}]   ;;  %s3658_s11 = inlined_call_operand.vmem [shape: f32[2,1,64], index: 11, kind: input, shape index: {}]   ;;  %s3659_s12 = inlined_call_operand.vmem [shape: f32[2,64,32], index: 12, kind: input, shape index: {}]   ;;  %s3660_s13 = inlined_call_operand.vmem [shape: f32[2,1,32], index: 13, kind: input, shape index: {}]   ;;  %s3661_s14 = inlined_call_operand.vmem [shape: f32[2,1,32], index: 14, kind: input, shape index: {}]   ;;  %s3662_s15 = inlined_call_operand.vmem [shape: f32[2,1,32], index: 15, kind: input, shape index: {}]   ;;  %s3663_s16 = inlined_call_operand.vmem [shape: f32[32,32], index: 16, kind: input, shape index: {}]   ;;  %s3664_s17 = inlined_call_operand.vmem [shape: f32[1,32], index: 17, kind: input, shape index: {}]   ;;  %s3665_s18 = inlined_call_operand.hbm [shape: f32[2,32], index: 18, kind: output, shape index: {}]  }
   0x1   :  { %3667 = sst [smem:[#allocation6_spill]] %s3647_s0 }
   0x2   :  { %3668 = sst [smem:[#allocation7_spill]] %s3648_s1 }
   0x3   :  { %3669 = sst [smem:[#allocation8_spill]] %s3649_s2 }
   0x4   :  { %s3670_s29 = sld [smem:[#allocation6_spill]]  ;;  %vm64_vm0 = vcmask 261120  }
   0xa   :  { %v60_v0 = vld [vmem:[%s3670_s29] sm:$0xff]  ;;  %v61_v1 = vld [vmem:[%s3670_s29 + $0x8] sm:$0xff] }
   0xb   :  { %23 = vsyncpa [#allocation4], 0  ;;  %v65_v2 = vsel %vm64_vm0, %v60_v0, 0.0  ;;  %v68_v3 = vsel %vm64_vm0, %v61_v1, 0.0  ;;  %v109_v14 = vld [vmem:[%s3651_s4] sm:$0xff]  ;;  %v110_v15 = vld [vmem:[%s3651_s4 + $0x8] sm:$0xff]  ;;  %v280_v45 = vlaneseq }
   0xc   :  { %66 = vadd.xlane.f32.xlu0 %v65_v2  ;;  %v111_v16 = vld [vmem:[%s3651_s4 + $0x10] sm:$0xff]  ;;  %v2930_v17 = vpack.c.bf16 %v110_v15, %v109_v14  ;;  %v112_v18 = vld [vmem:[%s3651_s4 + $0x18] sm:$0xff]  ;;  %s3671_s27 = sld [smem:[#allocation8_spill]]  ;;  %v2553_v29 = vld [vmem:[%s3650_s3] ss:$0 sm:$0xff]  ;;  %v3115_v36 = vmov 0.0  }
   0xd   :  { %v2934_v19 = vpack.c.bf16 %v112_v18, %v111_v16  ;;  %2746 = vmatprep.subr.mxu1 %v3115_v36  ;;  %vm3116_vm1 = vmmov 0   ;;  %v2554_v37 = vld [vmem:[%s3652_s5] ss:$0 sm:$0xff]  ;;  %s3117_s0 = smov 96   ;;  %s3118_s19 = smov 80   ;;  %vm204_vm2 = vcmask 130048  }
   0xe   :  { %2931 = vmatprep.subr.bf16.mxu0 %v2930_v17  ;;  %2748 = vmatprep.mubr.msk.f32.mxu1 %vm3116_vm1, %v3115_v36  ;;  %s3119_s1 = smov 112   ;;  %v281_v46 = vshrl.u32 %v280_v45, 7  ;;  %s3672_s22 = sld [smem:[#allocation7_spill]]  ;;  %vm285_vm3 = vcmask 64512   ;;  %vm545_vm4 = vcmask 261248   ;;  %vm1147_vm5 = vcmask 523264  }
   0xf   :  { %2933 = vmatpush3.bf16.msra.mxu0 %v2930_v17  ;;  %s3120_s2 = smov 64   ;;  %s3121_s23 = smov 48   ;;  %vm2535_vm6 = vcmask 253952  }
  0x10   :  { %69 = vadd.xlane.f32.xlu0 %v68_v3  ;;  %2935 = vmatprep.subr.bf16.mxu0 %v2934_v19  ;;  %v282_v47 = vsub.s32 0, %v281_v46  ;;  %v627_v54 = vsub.s32 1, %v281_v46  ;;  %s3122_s20 = smov 16  }
  0x12   :  { %v2552_v27 = vld [vmem:[%s3671_s27] ss:$0 sm:$0xff] }
  0x13   :  { %2937 = vmatpush3.bf16.msra.mxu0 %v2934_v19 }
  0x14   :  { %2766 = vmatprep.subr.mxu0 %v3115_v36  ;;  %v108_v48 = vld [vmem:[%s3672_s22] sm:$0x3] }
  0x15   :  { %v3291_v49 = vrot.slane %v108_v48, %v282_v47  ;;  %v3295_v56 = vrot.slane %v108_v48, %v627_v54  ;;  %v893_v54 = vld [vmem:[%s3653_s6 + $0x8] sm:$0xff] }
  0x99   :  { %v67_v4 = vpop.xlane.xlu0 %66 }
  0x9a   :  { %v72_v5 = vmul.f32 0.03125, %v67_v4 }
  0x9c   :  { %v74_v6 = vsub.f32 %v60_v0, %v72_v5 }
  0x9d   :  { %v70_v7 = vpop.xlane.xlu0 %69 }
  0x9e   :  { %v73_v8 = vmul.f32 0.03125, %v70_v7  ;;  %v76_v9 = vmul.f32 %v74_v6, %v74_v6 }
  0xa0   :  { %v75_v10 = vsub.f32 %v61_v1, %v73_v8  ;;  %v78_v11 = vsel %vm64_vm0, %v76_v9, 0.0 }
  0xa1   :  { %79 = vadd.xlane.f32.xlu1 %v78_v11 }
  0xa2   :  { %v77_v12 = vmul.f32 %v75_v10, %v75_v10 }
  0xa4   :  { %v81_v13 = vsel %vm64_vm0, %v77_v12, 0.0 }
  0xa5   :  { %82 = vadd.xlane.f32.xlu1 %v81_v13 }
 0x12e   :  { %v80_v20 = vpop.xlane.xlu1 %79 }
 0x12f   :  { %v84_v21 = vmul.f32 0.03125, %v80_v20 }
 0x131   :  { %v86_v22 = vadd.f32 1e-12, %v84_v21 }
 0x132   :  { %v83_v23 = vpop.xlane.xlu1 %82 }
 0x133   :  { %3027 = vrsqrt.f32 %v86_v22  ;;  %v85_v24 = vmul.f32 0.03125, %v83_v23 }
 0x135   :  { %v87_v25 = vadd.f32 1e-12, %v85_v24 }
 0x137   :  { %3029 = vrsqrt.f32 %v87_v25 }
 0x13d   :  { %v3028_v26 = vpop.eup %3027 }
 0x13e   :  { %v90_v28 = vmul.f32 %v3028_v26, %v74_v6 }
 0x140   :  { %v98_v30 = vmul.f32 %v2552_v27, %v90_v28 }
 0x141   :  { %v3030_v31 = vpop.eup %3029 }
 0x142   :  { %v91_v32 = vmul.f32 %v3030_v31, %v75_v10  ;;  %v3247_v33 = vadd.f32 %v2553_v29, %v98_v30 }
 0x144   :  { %v99_v34 = vmul.f32 %v2552_v27, %v91_v32  ;;  %2743 = vmatprep.mubr.msk.f32.mxu0 %vm64_vm0, %v3247_v33 }
 0x146   :  { %v3251_v35 = vadd.f32 %v2553_v29, %v99_v34 }
 0x148   :  { %2744 = vmatmul.mubr.msk.f32.vlgmr.msra.gmra.mrb[0].mxu0 %vm64_vm0, %v3251_v35 }
 0x149   :  { %2768 = vmatprep.mubr.msk.f32.mxu0 %vm3116_vm1, %v3115_v36 }
 0x21b   :  { %v2745_v38 = vpop.f32.mrb[0].mxu0 }
 0x21c   :  { %v192_v39 = vpop.f32.mrb[1].mxu0  ;;  %v3270_v41 = vadd.f32 %v2745_v38, %v2554_v37 }
 0x21d   :  { %v3264_v40 = vadd.f32 %v2554_v37, %v192_v39 }
 0x21f   :  { %202 = vrot.lane.b32.xlu0 %v3264_v40, %s3117_s0 }
 0x223   :  { %376 = vrot.lane.b32.xlu0 %v3264_v40, %s3118_s19 }
 0x227   :  { %548 = vrot.lane.b32.xlu0 %v3270_v41, %s3117_s0 }
 0x22b   :  { %718 = vrot.lane.b32.xlu0 %v3270_v41, %s3119_s1 }
 0x291   :  { %v203_v42 = vpop.permute.xlu0 %202 }
 0x292   :  { %2747 = vmatpush3.xpose.msk.msra.mxu1 %vm204_vm2, %v203_v42 }
 0x293   :  { %2751 = vmatprep.subr.mxu1 %v3115_v36 }
 0x295   :  { %2749 = vmatmul.mubr.msk.f32.vlgmr.msra.gmra.mrb[0].mxu1 %vm204_vm2, %v3264_v40  ;;  %v377_v43 = vpop.permute.xlu0 %376 }
 0x296   :  { %2753 = vmatprep.mubr.msk.f32.mxu1 %vm3116_vm1, %v3115_v36 }
 0x299   :  { %v549_v44 = vpop.permute.xlu0 %548 }
 0x29a   :  { %2767 = vmatpush3.xpose.msk.msra.mxu0 %vm204_vm2, %v549_v44 }
 0x29b   :  { %2776 = vmatprep.subr.mxu0 %v3115_v36 }
 0x29d   :  { %2769 = vmatmul.mubr.msk.f32.vlgmr.msra.gmra.mrb[2].mxu0 %vm204_vm2, %v3270_v41  ;;  %v719_v7 = vpop.permute.xlu0 %718 }
 0x29e   :  { %2778 = vmatprep.mubr.msk.f32.mxu0 %vm3116_vm1, %v3115_v36 }
 0x368   :  { %v275_v50 = vpop.f32.mrb[0].mxu1 }
 0x369   :  { %v279_v51 = vmul.f32 0.25, %v275_v50  ;;  %v2750_v52 = vpop.f32.mrb[1].mxu1 }
 0x36b   :  { %v284_v53 = vadd.f32 %v3291_v49, %v279_v51 }
 0x36d   :  { %v286_v55 = vsel %vm285_vm3, %v284_v53, -inf }
 0x36e   :  { %287 = vmax.xlane.f32.xlu1 %v286_v55 }
 0x370   :  { %v620_v57 = vpop.f32.mrb[2].mxu0 }
 0x371   :  { %v624_v58 = vmul.f32 0.25, %v620_v57  ;;  %v2770_v59 = vpop.f32.mrb[3].mxu0  ;;  %v894_v57 = vld [vmem:[%s3653_s6 + $0x10] sm:$0xff] }
 0x373   :  { %v629_v60 = vadd.f32 %v3295_v56, %v624_v58  ;;  %v895_v58 = vld [vmem:[%s3653_s6 + $0x18] sm:$0xff] }
 0x374   :  { %v2942_v59 = vpack.c.bf16 %v895_v58, %v894_v57  ;;  %v1137_v57 = vld [vmem:[%s3659_s12 + $0x28] sm:$0xff] }
 0x375   :  { %v630_v61 = vsel %vm285_vm3, %v629_v60, -inf }
 0x376   :  { %631 = vmax.xlane.f32.xlu0 %v630_v61 }
 0x37f   :  { %297 = vrot.lane.b32.xlu1 %v3264_v40, %s3120_s2 }
 0x383   :  { %374 = vrot.lane.b32.xlu1 %v3264_v40, %s3119_s1 }
 0x3fb   :  { %v288_v62 = vpop.xlane.xlu1 %287 }
 0x3fc   :  { %v289_v63 = vsub.f32 %v284_v53, %v288_v62  ;;  %v892_v53 = vld [vmem:[%s3653_s6] sm:$0xff] }
 0x3fd   :  { %v2938_v55 = vpack.c.bf16 %v893_v54, %v892_v53  ;;  %v1135_v53 = vld [vmem:[%s3659_s12 + $0x18] sm:$0xff] }
 0x3fe   :  { %v290_v0 = vmul.f32 1.442695, %v289_v63 }
 0x3ff   :  { %v298_v1 = vpop.permute.xlu1 %297 }
 0x400   :  { %3031 = vpow2.f32 %v290_v0  ;;  %2752 = vmatpush3.msra.mxu1 %v298_v1 }
 0x401   :  { %2756 = vmatprep.subr.mxu1 %v3115_v36 }
 0x403   :  { %v375_v4 = vpop.permute.xlu1 %374  ;;  %v632_v10 = vpop.xlane.xlu0 %631 }
 0x404   :  { %v633_v11 = vsub.f32 %v629_v60, %v632_v10 }
 0x406   :  { %v634_v15 = vmul.f32 1.442695, %v633_v11 }
 0x40a   :  { %v3032_v2 = vpop.eup %3031 }
 0x40b   :  { %v292_v3 = vsel %vm285_vm3, %v3032_v2, 0.0 }
 0x40c   :  { %293 = vadd.xlane.f32.xlu1 %v292_v3 }
 0x41d   :  { %720 = vrot.lane.b32.xlu1 %v3270_v41, %s3118_s19 }
 0x499   :  { %v294_v5 = vpop.xlane.xlu1 %293 }
 0x49a   :  { %3033 = vrcp.f32 %v294_v5 }
 0x49b   :  { %3035 = vpow2.f32 %v634_v15 }
 0x49d   :  { %v721_v6 = vpop.permute.xlu1 %720 }
 0x49e   :  { %2777 = vmatpush3.xpose.msk.msra.mxu0 %vm204_vm2, %v721_v6  ;;  %v2569_v6 = vld [vmem:[%s3654_s7] ss:$0 sm:$0xff] }
 0x49f   :  { %2939 = vmatprep.subr.bf16.mxu0 %v2938_v55 }
 0x4a1   :  { %2779 = vmatmul.mubr.msk.f32.vlgmr.msra.gmra.mrb[4].mxu0 %vm204_vm2, %v719_v7 }
 0x4a2   :  { %2941 = vmatpush3.bf16.msra.mxu0 %v2938_v55  ;;  %v1136_v55 = vld [vmem:[%s3659_s12 + $0x20] sm:$0xff] }
 0x4a3   :  { %2943 = vmatprep.subr.bf16.mxu0 %v2942_v59  ;;  %v2962_v58 = vpack.c.bf16 %v1137_v57, %v1136_v55  ;;  %v2587_v57 = vld [vmem:[%s3652_s5 + $0x1] ss:$0 sm:$0xff] }
 0x4a4   :  { %v3034_v8 = vpop.eup %3033 }
 0x4a5   :  { %v296_v9 = vmul.f32 %v3034_v8, %v3032_v2  ;;  %v3036_v25 = vpop.eup %3035 }
 0x4a6   :  { %v636_v26 = vsel %vm285_vm3, %v3036_v25, 0.0  ;;  %2945 = vmatpush3.bf16.msra.mxu0 %v2942_v59  ;;  %v1138_v59 = vld [vmem:[%s3659_s12 + $0x30] sm:$0xff] }
 0x4a7   :  { %2754 = vmatmul.mubr.msk.f32.vlgmr.msra.gmra.mrb[2].mxu1 %vm285_vm3, %v296_v9 }
 0x4a8   :  { %2757 = vmatpush3.xpose.msk.msra.mxu1 %vm204_vm2, %v377_v43  ;;  %2758 = vmatprep.mubr.msk.f32.mxu1 %vm3116_vm1, %v3115_v36 }
 0x4a9   :  { %2761 = vmatprep.subr.mxu1 %v3115_v36 }
 0x4ab   :  { %2759 = vmatmul.mubr.msk.f32.vlgmr.msra.gmra.mrb[4].mxu1 %vm204_vm2, %v375_v4 }
 0x4ac   :  { %2763 = vmatprep.mubr.msk.f32.mxu1 %vm3116_vm1, %v3115_v36 }
 0x574   :  { %v792_v12 = vpop.f32.mrb[4].mxu0 }
 0x575   :  { %v796_v13 = vmul.f32 0.25, %v792_v12  ;;  %v2780_v14 = vpop.f32.mrb[5].mxu0 }
 0x577   :  { %v797_v16 = vadd.f32 %v796_v13, %v3295_v56 }
 0x579   :  { %v798_v17 = vsel %vm285_vm3, %v797_v16, -inf }
 0x57a   :  { %v369_v18 = vpop.f32.mrb[2].mxu1  ;;  %799 = vmax.xlane.f32.xlu0 %v798_v17 }
 0x57b   :  { %373 = vst.msk [vmem:[#allocation2] sm:$0xff] %vm204_vm2, %v369_v18  ;;  %v2755_v19 = vpop.f32.mrb[3].mxu1 }
 0x57e   :  { %v448_v20 = vpop.f32.mrb[4].mxu1 }
 0x57f   :  { %v452_v21 = vmul.f32 0.25, %v448_v20  ;;  %v2760_v22 = vpop.f32.mrb[5].mxu1 }
 0x581   :  { %v453_v23 = vadd.f32 %v452_v21, %v3291_v49 }
 0x583   :  { %v454_v24 = vsel %vm285_vm3, %v453_v23, -inf }
 0x584   :  { %455 = vmax.xlane.f32.xlu1 %v454_v24  ;;  %v1031_v24 = vld [vmem:[%s3657_s10 + $0x8] sm:$0xff] }
 0x588   :  { %637 = vadd.xlane.f32.xlu1 %v636_v26  ;;  %v1032_v26 = vld [vmem:[%s3657_s10 + $0x10] sm:$0xff] }
 0x599   :  { %465 = vrot.lane.b32.xlu1 %v3264_v40, %s3121_s23 }
 0x59d   :  { %809 = vrot.lane.b32.xlu1 %v3270_v41, %s3121_s23 }
 0x607   :  { %v800_v27 = vpop.xlane.xlu0 %799 }
 0x608   :  { %v801_v28 = vsub.f32 %v797_v16, %v800_v27  ;;  %v1033_v27 = vld [vmem:[%s3657_s10 + $0x18] sm:$0xff] }
 0x60a   :  { %v802_v29 = vmul.f32 1.442695, %v801_v28  ;;  %v2950_v28 = vpack.c.bf16 %v1033_v27, %v1032_v26 }
 0x60c   :  { %3037 = vpow2.f32 %v802_v29 }
 0x611   :  { %v456_v30 = vpop.xlane.xlu1 %455 }
 0x612   :  { %v457_v31 = vsub.f32 %v453_v23, %v456_v30 }
 0x614   :  { %v458_v32 = vmul.f32 1.442695, %v457_v31 }
 0x615   :  { %v638_v34 = vpop.xlane.xlu1 %637 }
 0x616   :  { %v3038_v37 = vpop.eup %3037  ;;  %3039 = vpow2.f32 %v458_v32 }
 0x617   :  { %v804_v38 = vsel %vm285_vm3, %v3038_v37, 0.0 }
 0x618   :  { %805 = vadd.xlane.f32.xlu0 %v804_v38 }
 0x619   :  { %v466_v39 = vpop.permute.xlu1 %465 }
 0x61a   :  { %2762 = vmatpush3.msra.mxu1 %v466_v39  ;;  %v2572_v39 = vld [vmem:[%s3655_s8] ss:$0 sm:$0xff] }
 0x61b   :  { %2771 = vmatprep.subr.mxu1 %v3115_v36 }
 0x620   :  { %v3040_v40 = vpop.eup %3039 }
 0x621   :  { %v460_v42 = vsel %vm285_vm3, %v3040_v40, 0.0 }
 0x622   :  { %461 = vadd.xlane.f32.xlu0 %v460_v42  ;;  %v2573_v42 = vld [vmem:[%s3656_s9] ss:$0 sm:$0xff] }
 0x638   :  { %641 = vrot.lane.b32.xlu0 %v3270_v41, %s3120_s2  ;;  %v810_v41 = vpop.permute.xlu1 %809 }
 0x6a5   :  { %v806_v43 = vpop.xlane.xlu0 %805 }
 0x6af   :  { %v462_v44 = vpop.xlane.xlu0 %461 }
 0x6b0   :  { %3041 = vrcp.f32 %v462_v44 }
 0x6b1   :  { %3043 = vrcp.f32 %v638_v34 }
 0x6b2   :  { %3045 = vrcp.f32 %v806_v43 }
 0x6b3   :  { %v642_v48 = vpop.permute.xlu0 %641 }
 0x6ba   :  { %v3042_v45 = vpop.eup %3041 }
 0x6bb   :  { %v464_v46 = vmul.f32 %v3042_v45, %v3040_v40  ;;  %v3044_v47 = vpop.eup %3043 }
 0x6bc   :  { %v640_v50 = vmul.f32 %v3044_v47, %v3036_v25  ;;  %v3046_v51 = vpop.eup %3045 }
 0x6bd   :  { %2764 = vmatmul.mubr.msk.f32.vlgmr.msra.gmra.mrb[6].mxu1 %vm285_vm3, %v464_v46  ;;  %v808_v52 = vmul.f32 %v3046_v51, %v3038_v37  ;;  %v1133_v51 = vld [vmem:[%s3659_s12 + $0x8] sm:$0xff] }
 0x6be   :  { %2772 = vmatpush3.msra.mxu1 %v642_v48  ;;  %2773 = vmatprep.mubr.msk.f32.mxu1 %vm3116_vm1, %v3115_v36 }
 0x6bf   :  { %2781 = vmatprep.subr.mxu1 %v3115_v36 }
 0x6c1   :  { %2774 = vmatmul.mubr.msk.f32.vlgmr.msra.gmra.mrb[8].mxu1 %vm285_vm3, %v640_v50  ;;  %v1132_v50 = vld [vmem:[%s3659_s12] sm:$0xff] }
 0x6c2   :  { %2782 = vmatpush3.msra.mxu1 %v810_v41  ;;  %2783 = vmatprep.mubr.msk.f32.mxu1 %vm3116_vm1, %v3115_v36  ;;  %v2954_v41 = vpack.c.bf16 %v1133_v51, %v1132_v50 }
 0x6c4   :  { %2955 = vmatprep.subr.bf16.mxu0 %v2954_v41 }
 0x6c5   :  { %2784 = vmatmul.mubr.msk.f32.vlgmr.msra.gmra.mrb[10].mxu1 %vm285_vm3, %v808_v52  ;;  %v1134_v52 = vld [vmem:[%s3659_s12 + $0x10] sm:$0xff] }
 0x6c6   :  { %v2958_v54 = vpack.c.bf16 %v1135_v53, %v1134_v52 }
 0x790   :  { %v537_v60 = vpop.f32.mrb[6].mxu1 }
 0x791   :  { %542 = vrot.lane.b32.xlu1 %v537_v60, %s3122_s20  ;;  %v2765_v61 = vpop.f32.mrb[7].mxu1  ;;  %v1139_v60 = vld [vmem:[%s3659_s12 + $0x38] sm:$0xff] }
 0x792   :  { %v2966_v61 = vpack.c.bf16 %v1139_v60, %v1138_v59 }
 0x794   :  { %v713_v62 = vpop.f32.mrb[8].mxu1 }
 0x795   :  { %717 = vst.msk [vmem:[#allocation2 + $0x8] sm:$0xff] %vm204_vm2, %v713_v62  ;;  %v2775_v63 = vpop.f32.mrb[9].mxu1  ;;  %v2574_v62 = vld [vmem:[%s3658_s11] ss:$0 sm:$0xff] }
 0x798   :  { %v881_v0 = vpop.f32.mrb[10].mxu1 }
 0x799   :  { %886 = vrot.lane.b32.xlu1 %v881_v0, %s3122_s20  ;;  %v2785_v1 = vpop.f32.mrb[11].mxu1 }
 0x803   :  { %v543_v2 = vpop.permute.xlu1 %542 }
 0x804   :  { %546 = vst.msk [vmem:[#allocation2] sm:$0xff] %vm545_vm4, %v543_v2 }
 0x80b   :  { %v887_v3 = vpop.permute.xlu1 %886  ;;  %v890_v4 = vld [vmem:[#allocation2] sm:$0xff] }
 0x80c   :  { %889 = vst.msk [vmem:[#allocation2 + $0x8] sm:$0xff] %vm545_vm4, %v887_v3  ;;  %2794 = vmatprep.mubr.msk.f32.mxu0 %vm64_vm0, %v890_v4 }
 0x813   :  { %v891_v5 = vld [vmem:[#allocation2 + $0x8] sm:$0xff] }
 0x814   :  { %2795 = vmatmul.mubr.msk.f32.vlgmr.msra.gmra.mrb[6].mxu0 %vm64_vm0, %v891_v5 }
 0x815   :  { %2957 = vmatpush3.bf16.msra.mxu0 %v2954_v41  ;;  %v2581_v41 = vld [vmem:[%s3662_s15] ss:$0 sm:$0xff] }
 0x816   :  { %2959 = vmatprep.subr.bf16.mxu0 %v2958_v54 }
 0x819   :  { %2961 = vmatpush3.bf16.msra.mxu0 %v2958_v54 }
 0x81a   :  { %2963 = vmatprep.subr.bf16.mxu0 %v2962_v58 }
 0x81d   :  { %2965 = vmatpush3.bf16.msra.mxu0 %v2962_v58 }
 0x81e   :  { %2967 = vmatprep.subr.bf16.mxu0 %v2966_v61 }
 0x821   :  { %2969 = vmatpush3.bf16.msra.mxu0 %v2966_v61 }
 0x822   :  { %2848 = vmatprep.subr.mxu0 %v3115_v36 }
 0x8e7   :  { %v2796_v7 = vpop.f32.mrb[6].mxu0 }
 0x8e8   :  { %v981_v8 = vadd.f32 %v2796_v7, %v2569_v6  ;;  %v975_v9 = vpop.f32.mrb[7].mxu0 }
 0x8e9   :  { %v976_v10 = vadd.f32 %v2569_v6, %v975_v9 }
 0x8ea   :  { %v985_v11 = vadd.f32 %v981_v8, %v3251_v35 }
 0x8eb   :  { %v984_v12 = vadd.f32 %v976_v10, %v3247_v33  ;;  %v1030_v33 = vld [vmem:[%s3657_s10] sm:$0xff] }
 0x8ec   :  { %v991_v13 = vsel %vm64_vm0, %v985_v11, 0.0  ;;  %v2946_v25 = vpack.c.bf16 %v1031_v24, %v1030_v33 }
 0x8ed   :  { %992 = vadd.xlane.f32.xlu1 %v991_v13  ;;  %v988_v14 = vsel %vm64_vm0, %v984_v12, 0.0  ;;  %v2577_v13 = vld [vmem:[%s3660_s13] ss:$0 sm:$0xff] }
 0x8ee   :  { %989 = vadd.xlane.f32.xlu0 %v988_v14  ;;  %2947 = vmatprep.subr.bf16.mxu1 %v2946_v25 }
 0x8ef   :  { %2949 = vmatpush3.bf16.msra.mxu1 %v2946_v25 }
 0x8f0   :  { %2951 = vmatprep.subr.bf16.mxu1 %v2950_v28 }
 0x8f3   :  { %2953 = vmatpush3.bf16.msra.mxu1 %v2950_v28 }
 0x97a   :  { %v993_v15 = vpop.xlane.xlu1 %992 }
 0x97b   :  { %v995_v16 = vmul.f32 0.03125, %v993_v15  ;;  %v990_v17 = vpop.xlane.xlu0 %989 }
 0x97c   :  { %v994_v18 = vmul.f32 0.03125, %v990_v17 }
 0x97d   :  { %v997_v19 = vsub.f32 %v985_v11, %v995_v16 }
 0x97e   :  { %v996_v20 = vsub.f32 %v984_v12, %v994_v18 }
 0x97f   :  { %v999_v23 = vmul.f32 %v997_v19, %v997_v19 }
 0x980   :  { %v998_v21 = vmul.f32 %v996_v20, %v996_v20 }
 0x981   :  { %v1003_v35 = vsel %vm64_vm0, %v999_v23, 0.0 }
 0x982   :  { %v1000_v22 = vsel %vm64_vm0, %v998_v21, 0.0 }
 0x983   :  { %1001 = vadd.xlane.f32.xlu0 %v1000_v22 }
 0x987   :  { %1004 = vadd.xlane.f32.xlu0 %v1003_v35 }
 0xa10   :  { %v1002_v29 = vpop.xlane.xlu0 %1001 }
 0xa11   :  { %v1006_v30 = vmul.f32 0.03125, %v1002_v29 }
 0xa13   :  { %v1008_v31 = vadd.f32 1e-12, %v1006_v30  ;;  %v2582_v30 = vld [vmem:[%s3651_s4 + $0x20] sm:$0xff] }
 0xa14   :  { %v1005_v32 = vpop.xlane.xlu0 %1004 }
 0xa15   :  { %3047 = vrsqrt.f32 %v1008_v31  ;;  %v1007_v34 = vmul.f32 0.03125, %v1005_v32  ;;  %v2583_v31 = vld [vmem:[%s3651_s4 + $0x28] sm:$0xff] }
 0xa16   :  { %v2970_v32 = vpack.c.bf16 %v2583_v31, %v2582_v30 }
 0xa17   :  { %v1009_v37 = vadd.f32 1e-12, %v1007_v34  ;;  %v2584_v34 = vld [vmem:[%s3651_s4 + $0x30] sm:$0xff] }
 0xa18   :  { %2971 = vmatprep.subr.bf16.mxu1 %v2970_v32 }
 0xa19   :  { %3049 = vrsqrt.f32 %v1009_v37  ;;  %v2585_v37 = vld [vmem:[%s3651_s4 + $0x38] sm:$0xff] }
 0xa1f   :  { %v3048_v38 = vpop.eup %3047 }
 0xa20   :  { %v1012_v40 = vmul.f32 %v3048_v38, %v996_v20  ;;  %v2974_v38 = vpack.c.bf16 %v2585_v37, %v2584_v34 }
 0xa22   :  { %v1020_v43 = vmul.f32 %v2572_v39, %v1012_v40 }
 0xa23   :  { %v3050_v44 = vpop.eup %3049 }
 0xa24   :  { %v1013_v45 = vmul.f32 %v3050_v44, %v997_v19  ;;  %v1028_v46 = vadd.f32 %v2573_v42, %v1020_v43 }
 0xa26   :  { %v1021_v47 = vmul.f32 %v2572_v39, %v1013_v45  ;;  %2805 = vmatprep.mubr.msk.f32.mxu1 %vm64_vm0, %v1028_v46 }
 0xa28   :  { %v1029_v48 = vadd.f32 %v2573_v42, %v1021_v47  ;;  %v2580_v47 = vld [vmem:[%s3661_s14] ss:$0 sm:$0xff] }
 0xa2a   :  { %2806 = vmatmul.mubr.msk.f32.vlgmr.msra.gmra.mrb[12].mxu1 %vm64_vm0, %v1029_v48 }
 0xa2b   :  { %2973 = vmatpush3.bf16.msra.mxu1 %v2970_v32 }
 0xa2c   :  { %2975 = vmatprep.subr.bf16.mxu1 %v2974_v38 }
 0xa2f   :  { %2977 = vmatpush3.bf16.msra.mxu1 %v2974_v38 }
 0xa30   :  { %2838 = vmatprep.subr.mxu1 %v3115_v36 }
 0xafd   :  { %v2807_v63 = vpop.f32.mrb[12].mxu1 }
 0xafe   :  { %v1119_v0 = vadd.f32 %v2807_v63, %v2574_v62  ;;  %v1113_v1 = vpop.f32.mrb[13].mxu1 }
 0xaff   :  { %v1114_v2 = vadd.f32 %v2574_v62, %v1113_v1 }
 0xb00   :  { %v1125_v3 = vmul.f32 0.70710677, %v1119_v0  ;;  %v1123_v10 = vmul.f32 0.5, %v1119_v0 }
 0xb01   :  { %v1124_v4 = vmul.f32 0.70710677, %v1114_v2  ;;  %v1122_v8 = vmul.f32 0.5, %v1114_v2 }
 0xb02   :  { %3051 = verf.f32 %v1125_v3 }
 0xb03   :  { %3053 = verf.f32 %v1124_v4 }
 0xb0c   :  { %v3052_v5 = vpop.eup %3051 }
 0xb0d   :  { %v3054_v6 = vpop.eup %3053  ;;  %v1129_v7 = vadd.f32 1.0, %v3052_v5 }
 0xb0e   :  { %v1128_v9 = vadd.f32 1.0, %v3054_v6 }
 0xb0f   :  { %v1131_v12 = vmul.f32 %v1129_v7, %v1123_v10 }
 0xb10   :  { %v1130_v11 = vmul.f32 %v1128_v9, %v1122_v8 }
 0xb12   :  { %2824 = vmatprep.mubr.msk.f32.mxu0 %vm1147_vm5, %v1130_v11 }
 0xb13   :  { %2825 = vmatmul.mubr.msk.f32.vlgmr.msra.gmra.mrb[8].mxu0 %vm1147_vm5, %v1131_v12 }
 0xb14   :  { %2850 = vmatprep.mubr.msk.f32.mxu0 %vm3116_vm1, %v3115_v36 }
 0xbe6   :  { %v2826_v14 = vpop.f32.mrb[8].mxu0 }
 0xbe7   :  { %v1226_v15 = vadd.f32 %v2826_v14, %v2577_v13  ;;  %v1220_v16 = vpop.f32.mrb[9].mxu0 }
 0xbe8   :  { %v1221_v17 = vadd.f32 %v2577_v13, %v1220_v16 }
 0xbe9   :  { %v1230_v18 = vadd.f32 %v1226_v15, %v1029_v48 }
 0xbea   :  { %v1229_v19 = vadd.f32 %v1221_v17, %v1028_v46 }
 0xbeb   :  { %v1236_v20 = vsel %vm64_vm0, %v1230_v18, 0.0 }
 0xbec   :  { %1237 = vadd.xlane.f32.xlu1 %v1236_v20  ;;  %v1233_v21 = vsel %vm64_vm0, %v1229_v19, 0.0 }
 0xbed   :  { %1234 = vadd.xlane.f32.xlu0 %v1233_v21 }
 0xc79   :  { %v1238_v22 = vpop.xlane.xlu1 %1237 }
 0xc7a   :  { %v1240_v23 = vmul.f32 0.03125, %v1238_v22  ;;  %v1235_v35 = vpop.xlane.xlu0 %1234 }
 0xc7b   :  { %v1239_v33 = vmul.f32 0.03125, %v1235_v35 }
 0xc7c   :  { %v1242_v24 = vsub.f32 %v1230_v18, %v1240_v23 }
 0xc7d   :  { %v1241_v25 = vsub.f32 %v1229_v19, %v1239_v33 }
 0xc7e   :  { %v1244_v26 = vmul.f32 %v1242_v24, %v1242_v24 }
 0xc7f   :  { %v1243_v27 = vmul.f32 %v1241_v25, %v1241_v25 }
 0xc80   :  { %v1248_v28 = vsel %vm64_vm0, %v1244_v26, 0.0 }
 0xc81   :  { %1249 = vadd.xlane.f32.xlu1 %v1248_v28  ;;  %v1245_v29 = vsel %vm64_vm0, %v1243_v27, 0.0 }
 0xc82   :  { %1246 = vadd.xlane.f32.xlu0 %v1245_v29 }
 0xd0e   :  { %v1250_v39 = vpop.xlane.xlu1 %1249 }
 0xd0f   :  { %v1252_v40 = vmul.f32 0.03125, %v1250_v39  ;;  %v1247_v42 = vpop.xlane.xlu0 %1246 }
 0xd10   :  { %v1251_v43 = vmul.f32 0.03125, %v1247_v42 }
 0xd11   :  { %v1254_v44 = vadd.f32 1e-12, %v1252_v40 }
 0xd12   :  { %v1253_v45 = vadd.f32 1e-12, %v1251_v43 }
 0xd13   :  { %3055 = vrsqrt.f32 %v1254_v44 }
 0xd14   :  { %3057 = vrsqrt.f32 %v1253_v45 }
 0xd1d   :  { %v3056_v46 = vpop.eup %3055 }
 0xd1e   :  { %v3058_v48 = vpop.eup %3057  ;;  %v1258_v50 = vmul.f32 %v3056_v46, %v1242_v24 }
 0xd1f   :  { %v1257_v51 = vmul.f32 %v3058_v48, %v1241_v25 }
 0xd20   :  { %v1266_v52 = vmul.f32 %v2580_v47, %v1258_v50 }
 0xd21   :  { %v1265_v53 = vmul.f32 %v2580_v47, %v1257_v51 }
 0xd22   :  { %v3448_v55 = vadd.f32 %v2581_v41, %v1266_v52 }
 0xd23   :  { %v3446_v54 = vadd.f32 %v2581_v41, %v1265_v53 }
 0xd25   :  { %2835 = vmatprep.mubr.msk.f32.mxu1 %vm64_vm0, %v3446_v54 }
 0xd26   :  { %2836 = vmatmul.mubr.msk.f32.vlgmr.msra.gmra.mrb[14].mxu1 %vm64_vm0, %v3448_v55 }
 0xd27   :  { %2840 = vmatprep.mubr.msk.f32.mxu1 %vm3116_vm1, %v3115_v36 }
 0xdf9   :  { %v2837_v58 = vpop.f32.mrb[14].mxu1 }
 0xdfa   :  { %v1360_v59 = vpop.f32.mrb[15].mxu1  ;;  %v3465_v61 = vadd.f32 %v2837_v58, %v2587_v57 }
 0xdfb   :  { %v3459_v60 = vadd.f32 %v2587_v57, %v1360_v59 }
 0xdfd   :  { %1538 = vrot.lane.b32.xlu1 %v3459_v60, %s3118_s19  ;;  %1370 = vrot.lane.b32.xlu0 %v3459_v60, %s3117_s0 }
 0xe01   :  { %1536 = vrot.lane.b32.xlu1 %v3459_v60, %s3119_s1  ;;  %1877 = vrot.lane.b32.xlu0 %v3465_v61, %s3118_s19 }
 0xe05   :  { %1709 = vrot.lane.b32.xlu1 %v3465_v61, %s3117_s0 }
 0xe09   :  { %1875 = vrot.lane.b32.xlu1 %v3465_v61, %s3119_s1 }
 0xe6f   :  { %v1539_v62 = vpop.permute.xlu1 %1538  ;;  %v1371_v63 = vpop.permute.xlu0 %1370 }
 0xe70   :  { %2839 = vmatpush3.xpose.msk.msra.mxu1 %vm204_vm2, %v1371_v63  ;;  %2849 = vmatpush3.xpose.msk.msra.mxu0 %vm204_vm2, %v1539_v62 }
 0xe71   :  { %2858 = vmatprep.subr.mxu0 %v3115_v36  ;;  %2843 = vmatprep.subr.mxu1 %v3115_v36 }
 0xe73   :  { %v1537_v0 = vpop.permute.xlu1 %1536  ;;  %2841 = vmatmul.mubr.msk.f32.vlgmr.msra.gmra.mrb[16].mxu1 %vm204_vm2, %v3459_v60  ;;  %v1878_v2 = vpop.permute.xlu0 %1877 }
 0xe74   :  { %2851 = vmatmul.mubr.msk.f32.vlgmr.msra.gmra.mrb[10].mxu0 %vm204_vm2, %v1537_v0  ;;  %2845 = vmatprep.mubr.msk.f32.mxu1 %vm3116_vm1, %v3115_v36 }
 0xe75   :  { %2860 = vmatprep.mubr.msk.f32.mxu0 %vm3116_vm1, %v3115_v36 }
 0xe77   :  { %v1710_v1 = vpop.permute.xlu1 %1709 }
 0xe78   :  { %2859 = vmatpush3.xpose.msk.msra.mxu0 %vm204_vm2, %v1710_v1 }
 0xe79   :  { %2868 = vmatprep.subr.mxu0 %v3115_v36 }
 0xe7b   :  { %2861 = vmatmul.mubr.msk.f32.vlgmr.msra.gmra.mrb[12].mxu0 %vm204_vm2, %v3465_v61  ;;  %v1876_v3 = vpop.permute.xlu1 %1875 }
 0xe7c   :  { %2869 = vmatpush3.xpose.msk.msra.mxu0 %vm204_vm2, %v1878_v2  ;;  %2870 = vmatprep.mubr.msk.f32.mxu0 %vm3116_vm1, %v3115_v36 }
 0xe7f   :  { %2871 = vmatmul.mubr.msk.f32.vlgmr.msra.gmra.mrb[14].mxu0 %vm204_vm2, %v1876_v3 }
 0xf46   :  { %v1442_v4 = vpop.f32.mrb[16].mxu1 }
 0xf47   :  { %v1446_v5 = vmul.f32 0.25, %v1442_v4  ;;  %v2842_v6 = vpop.f32.mrb[17].mxu1  ;;  %v1610_v7 = vpop.f32.mrb[10].mxu0  ;;  %v2602_v4 = vld [vmem:[%s3653_s6 + $0x20] sm:$0xff] }
 0xf48   :  { %v1614_v8 = vmul.f32 0.25, %v1610_v7  ;;  %v2852_v9 = vpop.f32.mrb[11].mxu0  ;;  %v2604_v7 = vld [vmem:[%s3653_s6 + $0x30] sm:$0xff] }
 0xf49   :  { %v1447_v10 = vadd.f32 %v1446_v5, %v3291_v49  ;;  %v2603_v5 = vld [vmem:[%s3653_s6 + $0x28] sm:$0xff] }
 0xf4a   :  { %v1615_v11 = vadd.f32 %v1614_v8, %v3291_v49  ;;  %v2978_v6 = vpack.c.bf16 %v2603_v5, %v2602_v4  ;;  %v2605_v8 = vld [vmem:[%s3653_s6 + $0x38] sm:$0xff]  ;;  %v2619_v5 = vld [vmem:[%s3658_s11 + $0x1] ss:$0 sm:$0xff] }
 0xf4b   :  { %v1448_v12 = vsel %vm285_vm3, %v1447_v10, -inf  ;;  %v2982_v9 = vpack.c.bf16 %v2605_v8, %v2604_v7 }
 0xf4c   :  { %1449 = vmax.xlane.f32.xlu0 %v1448_v12  ;;  %v1616_v13 = vsel %vm285_vm3, %v1615_v11, -inf  ;;  %2979 = vmatprep.subr.bf16.mxu0 %v2978_v6 }
 0xf4d   :  { %1617 = vmax.xlane.f32.xlu1 %v1616_v13  ;;  %2981 = vmatpush3.bf16.msra.mxu0 %v2978_v6 }
 0xf4e   :  { %v1781_v14 = vpop.f32.mrb[12].mxu0  ;;  %2983 = vmatprep.subr.bf16.mxu0 %v2982_v9 }
 0xf4f   :  { %v1785_v15 = vmul.f32 0.25, %v1781_v14  ;;  %v2862_v16 = vpop.f32.mrb[13].mxu0 }
 0xf50   :  { %v2607_v16 = vld [vmem:[%s3654_s7 + $0x1] ss:$0 sm:$0xff] }
 0xf51   :  { %v1786_v17 = vadd.f32 %v1785_v15, %v3295_v56  ;;  %2985 = vmatpush3.bf16.msra.mxu0 %v2982_v9 }
 0xf52   :  { %v1949_v18 = vpop.f32.mrb[14].mxu0 }
 0xf53   :  { %v1953_v19 = vmul.f32 0.25, %v1949_v18  ;;  %v2872_v20 = vpop.f32.mrb[15].mxu0  ;;  %v1787_v21 = vsel %vm285_vm3, %v1786_v17, -inf }
 0xf54   :  { %1788 = vmax.xlane.f32.xlu0 %v1787_v21 }
 0xf55   :  { %v1954_v22 = vadd.f32 %v1953_v19, %v3295_v56 }
 0xf57   :  { %v1955_v49 = vsel %vm285_vm3, %v1954_v22, -inf }
 0xf58   :  { %1956 = vmax.xlane.f32.xlu0 %v1955_v49 }
 0xfd9   :  { %v1450_v23 = vpop.xlane.xlu0 %1449 }
 0xfda   :  { %v1451_v35 = vsub.f32 %v1447_v10, %v1450_v23  ;;  %v1618_v33 = vpop.xlane.xlu1 %1617 }
 0xfdb   :  { %v1619_v24 = vsub.f32 %v1615_v11, %v1618_v33 }
 0xfdc   :  { %v1452_v25 = vmul.f32 1.442695, %v1451_v35 }
 0xfdd   :  { %v1620_v26 = vmul.f32 1.442695, %v1619_v24 }
 0xfde   :  { %3059 = vpow2.f32 %v1452_v25 }
 0xfdf   :  { %3061 = vpow2.f32 %v1620_v26 }
 0xfe1   :  { %v1789_v27 = vpop.xlane.xlu0 %1788 }
 0xfe2   :  { %v1790_v28 = vsub.f32 %v1786_v17, %v1789_v27 }
 0xfe4   :  { %v1791_v29 = vmul.f32 1.442695, %v1790_v28 }
 0xfe5   :  { %v1957_v38 = vpop.xlane.xlu0 %1956 }
 0xfe6   :  { %3063 = vpow2.f32 %v1791_v29  ;;  %v1958_v39 = vsub.f32 %v1954_v22, %v1957_v38 }
 0xfe8   :  { %v3060_v30 = vpop.eup %3059  ;;  %v1959_v40 = vmul.f32 1.442695, %v1958_v39 }
 0xfe9   :  { %v3062_v31 = vpop.eup %3061  ;;  %v1454_v32 = vsel %vm285_vm3, %v3060_v30, 0.0 }
 0xfea   :  { %1455 = vadd.xlane.f32.xlu0 %v1454_v32  ;;  %v1622_v56 = vsel %vm285_vm3, %v3062_v31, 0.0  ;;  %3065 = vpow2.f32 %v1959_v40 }
 0xfeb   :  { %1623 = vadd.xlane.f32.xlu1 %v1622_v56  ;;  %v2616_v56 = vld [vmem:[%s3657_s10 + $0x30] sm:$0xff] }
 0xff0   :  { %v3064_v34 = vpop.eup %3063 }
 0xff1   :  { %v1793_v37 = vsel %vm285_vm3, %v3064_v34, 0.0 }
 0xff2   :  { %1794 = vadd.xlane.f32.xlu0 %v1793_v37 }
 0xff4   :  { %v3066_v42 = vpop.eup %3065 }
 0xff5   :  { %v1961_v43 = vsel %vm285_vm3, %v3066_v42, 0.0 }
 0xffc   :  { %1627 = vrot.lane.b32.xlu1 %v3459_v60, %s3121_s23 }
0x1000   :  { %1798 = vrot.lane.b32.xlu1 %v3465_v61, %s3120_s2 }
0x1008   :  { %1459 = vrot.lane.b32.xlu0 %v3459_v60, %s3120_s2 }
0x1024   :  { %1962 = vadd.xlane.f32.xlu1 %v1961_v43 }
0x1035   :  { %1966 = vrot.lane.b32.xlu1 %v3465_v61, %s3121_s23 }
0x1077   :  { %v1456_v44 = vpop.xlane.xlu0 %1455 }
0x1078   :  { %3067 = vrcp.f32 %v1456_v44  ;;  %v1624_v45 = vpop.xlane.xlu1 %1623 }
0x1079   :  { %3069 = vrcp.f32 %v1624_v45 }
0x107c   :  { %v1628_v50 = vpop.permute.xlu1 %1627 }
0x107f   :  { %v1795_v46 = vpop.xlane.xlu0 %1794 }
0x1080   :  { %3071 = vrcp.f32 %v1795_v46  ;;  %v1799_v53 = vpop.permute.xlu1 %1798  ;;  %v2612_v46 = vld [vmem:[%s3655_s8 + $0x1] ss:$0 sm:$0xff] }
0x1082   :  { %v3068_v47 = vpop.eup %3067 }
0x1083   :  { %v1458_v48 = vmul.f32 %v3068_v47, %v3060_v30  ;;  %v1460_v51 = vpop.permute.xlu0 %1459  ;;  %v3070_v41 = vpop.eup %3069 }
0x1084   :  { %2844 = vmatpush3.msra.mxu1 %v1460_v51  ;;  %v1626_v52 = vmul.f32 %v3070_v41, %v3062_v31  ;;  %v2615_v31 = vld [vmem:[%s3657_s10 + $0x28] sm:$0xff] }
0x1085   :  { %2846 = vmatmul.mubr.msk.f32.vlgmr.msra.gmra.mrb[18].mxu1 %vm285_vm3, %v1458_v48  ;;  %2853 = vmatprep.subr.mxu1 %v3115_v36  ;;  %v2613_v48 = vld [vmem:[%s3656_s9 + $0x1] ss:$0 sm:$0xff] }
0x1086   :  { %2854 = vmatpush3.msra.mxu1 %v1628_v50  ;;  %2855 = vmatprep.mubr.msk.f32.mxu1 %vm3116_vm1, %v3115_v36 }
0x1087   :  { %2863 = vmatprep.subr.mxu1 %v3115_v36 }
0x1089   :  { %2856 = vmatmul.mubr.msk.f32.vlgmr.msra.gmra.mrb[20].mxu1 %vm285_vm3, %v1626_v52 }
0x108a   :  { %v3072_v57 = vpop.eup %3071  ;;  %2864 = vmatpush3.msra.mxu1 %v1799_v53  ;;  %2865 = vmatprep.mubr.msk.f32.mxu1 %vm3116_vm1, %v3115_v36 }
0x108b   :  { %v1797_v58 = vmul.f32 %v3072_v57, %v3064_v34  ;;  %2873 = vmatprep.subr.mxu1 %v3115_v36  ;;  %v2617_v34 = vld [vmem:[%s3657_s10 + $0x38] sm:$0xff] }
0x108c   :  { %v2990_v37 = vpack.c.bf16 %v2617_v34, %v2616_v56  ;;  %v2441_v34 = vld [vmem:[%s3663_s16] sm:$0xff] }
0x108d   :  { %2866 = vmatmul.mubr.msk.f32.vlgmr.msra.gmra.mrb[22].mxu1 %vm285_vm3, %v1797_v58  ;;  %v2622_v58 = vld [vmem:[%s3659_s12 + $0x40] sm:$0xff] }
0x108e   :  { %2875 = vmatprep.mubr.msk.f32.mxu1 %vm3116_vm1, %v3115_v36 }
0x10b1   :  { %v1963_v59 = vpop.xlane.xlu1 %1962 }
0x10b2   :  { %3073 = vrcp.f32 %v1963_v59  ;;  %v2623_v59 = vld [vmem:[%s3659_s12 + $0x48] sm:$0xff] }
0x10b5   :  { %v1967_v60 = vpop.permute.xlu1 %1966 }
0x10b6   :  { %2874 = vmatpush3.msra.mxu1 %v1967_v60  ;;  %v2994_v60 = vpack.c.bf16 %v2623_v59, %v2622_v58 }
0x10b8   :  { %2995 = vmatprep.subr.bf16.mxu0 %v2994_v60 }
0x10bc   :  { %v3074_v61 = vpop.eup %3073 }
0x10bd   :  { %v1965_v62 = vmul.f32 %v3074_v61, %v3066_v42  ;;  %v2624_v61 = vld [vmem:[%s3659_s12 + $0x50] sm:$0xff] }
0x10bf   :  { %2876 = vmatmul.mubr.msk.f32.vlgmr.msra.gmra.mrb[24].mxu1 %vm285_vm3, %v1965_v62  ;;  %v2625_v62 = vld [vmem:[%s3659_s12 + $0x58] sm:$0xff] }
0x1158   :  { %v1531_v63 = vpop.f32.mrb[18].mxu1 }
0x1159   :  { %1535 = vst.msk [vmem:[#allocation2] sm:$0xff] %vm204_vm2, %v1531_v63  ;;  %v2847_v0 = vpop.f32.mrb[19].mxu1  ;;  %v2998_v63 = vpack.c.bf16 %v2625_v62, %v2624_v61  ;;  %v2638_v62 = vld [vmem:[%s3664_s17] ss:$0 sm:$0xff] }
0x115a   :  { %v2626_v0 = vld [vmem:[%s3659_s12 + $0x60] sm:$0xff] }
0x115c   :  { %v1699_v1 = vpop.f32.mrb[20].mxu1 }
0x115d   :  { %1704 = vrot.lane.b32.xlu0 %v1699_v1, %s3122_s20  ;;  %v2857_v2 = vpop.f32.mrb[21].mxu1  ;;  %v2627_v1 = vld [vmem:[%s3659_s12 + $0x68] sm:$0xff] }
0x115e   :  { %v3002_v2 = vpack.c.bf16 %v2627_v1, %v2626_v0 }
0x1160   :  { %v1870_v3 = vpop.f32.mrb[22].mxu1 }
0x1161   :  { %1874 = vst.msk [vmem:[#allocation2 + $0x8] sm:$0xff] %vm204_vm2, %v1870_v3  ;;  %v2867_v36 = vpop.f32.mrb[23].mxu1  ;;  %v2628_v3 = vld [vmem:[%s3659_s12 + $0x70] sm:$0xff] }
0x1162   :  { %v2629_v36 = vld [vmem:[%s3659_s12 + $0x78] sm:$0xff] }
0x1163   :  { %v3006_v4 = vpack.c.bf16 %v2629_v36, %v2628_v3 }
0x1192   :  { %v2038_v10 = vpop.f32.mrb[24].mxu1 }
0x1193   :  { %2043 = vrot.lane.b32.xlu1 %v2038_v10, %s3122_s20  ;;  %v2877_v11 = vpop.f32.mrb[25].mxu1 }
0x11cf   :  { %v1705_v12 = vpop.permute.xlu0 %1704 }
0x11d0   :  { %1707 = vst.msk [vmem:[#allocation2] sm:$0xff] %vm545_vm4, %v1705_v12 }
0x11d7   :  { %v2047_v13 = vld [vmem:[#allocation2] sm:$0xff] }
0x11d8   :  { %2886 = vmatprep.mubr.msk.f32.mxu0 %vm64_vm0, %v2047_v13 }
0x1205   :  { %v2044_v14 = vpop.permute.xlu1 %2043 }
0x1206   :  { %2046 = vst.msk [vmem:[#allocation2 + $0x8] sm:$0xff] %vm545_vm4, %v2044_v14 }
0x120d   :  { %v2048_v15 = vld [vmem:[#allocation2 + $0x8] sm:$0xff] }
0x120e   :  { %2887 = vmatmul.mubr.msk.f32.vlgmr.msra.gmra.mrb[16].mxu0 %vm64_vm0, %v2048_v15 }
0x120f   :  { %2997 = vmatpush3.bf16.msra.mxu0 %v2994_v60 }
0x1210   :  { %2999 = vmatprep.subr.bf16.mxu0 %v2998_v63 }
0x1213   :  { %3001 = vmatpush3.bf16.msra.mxu0 %v2998_v63 }
0x1214   :  { %3003 = vmatprep.subr.bf16.mxu0 %v3002_v2 }
0x1217   :  { %3005 = vmatpush3.bf16.msra.mxu0 %v3002_v2 }
0x1218   :  { %3007 = vmatprep.subr.bf16.mxu0 %v3006_v4 }
0x121b   :  { %3009 = vmatpush3.bf16.msra.mxu0 %v3006_v4 }
0x12e1   :  { %v2888_v17 = vpop.f32.mrb[16].mxu0 }
0x12e2   :  { %v2140_v18 = vadd.f32 %v2888_v17, %v2607_v16  ;;  %v2134_v19 = vpop.f32.mrb[17].mxu0 }
0x12e3   :  { %v2135_v20 = vadd.f32 %v2607_v16, %v2134_v19 }
0x12e4   :  { %v2144_v21 = vadd.f32 %v2140_v18, %v3448_v55 }
0x12e5   :  { %v2143_v22 = vadd.f32 %v2135_v20, %v3446_v54  ;;  %v2614_v54 = vld [vmem:[%s3657_s10 + $0x20] sm:$0xff] }
0x12e6   :  { %v2152_v49 = vsel %vm64_vm0, %v2144_v21, 0.0  ;;  %v2986_v32 = vpack.c.bf16 %v2615_v31, %v2614_v54  ;;  %v2631_v20 = vld [vmem:[%s3660_s13 + $0x1] ss:$0 sm:$0xff] }
0x12e7   :  { %2153 = vadd.xlane.f32.xlu1 %v2152_v49  ;;  %v2149_v23 = vsel %vm64_vm0, %v2143_v22, 0.0 }
0x12e8   :  { %2150 = vadd.xlane.f32.xlu0 %v2149_v23  ;;  %2987 = vmatprep.subr.bf16.mxu1 %v2986_v32 }
0x12e9   :  { %2989 = vmatpush3.bf16.msra.mxu1 %v2986_v32 }
0x12ea   :  { %2991 = vmatprep.subr.bf16.mxu1 %v2990_v37 }
0x12ed   :  { %2993 = vmatpush3.bf16.msra.mxu1 %v2990_v37  ;;  %v2442_v37 = vld [vmem:[%s3663_s16 + $0x8] sm:$0xff] }
0x1374   :  { %v2154_v35 = vpop.xlane.xlu1 %2153 }
0x1375   :  { %v2156_v33 = vmul.f32 0.03125, %v2154_v35  ;;  %v2151_v24 = vpop.xlane.xlu0 %2150 }
0x1376   :  { %v2155_v25 = vmul.f32 0.03125, %v2151_v24 }
0x1377   :  { %v2158_v26 = vsub.f32 %v2144_v21, %v2156_v33 }
0x1378   :  { %v2157_v27 = vsub.f32 %v2143_v22, %v2155_v25 }
0x1379   :  { %v2160_v30 = vmul.f32 %v2158_v26, %v2158_v26 }
0x137a   :  { %v2159_v28 = vmul.f32 %v2157_v27, %v2157_v27 }
0x137b   :  { %v2164_v55 = vsel %vm64_vm0, %v2160_v30, 0.0 }
0x137c   :  { %v2161_v29 = vsel %vm64_vm0, %v2159_v28, 0.0 }
0x137d   :  { %2162 = vadd.xlane.f32.xlu0 %v2161_v29 }
0x1381   :  { %2165 = vadd.xlane.f32.xlu0 %v2164_v55 }
0x140a   :  { %v2163_v38 = vpop.xlane.xlu0 %2162 }
0x140b   :  { %v2167_v39 = vmul.f32 0.03125, %v2163_v38  ;;  %v3010_v38 = vpack.c.bf16 %v2442_v37, %v2441_v34 }
0x140d   :  { %v2169_v40 = vadd.f32 1e-12, %v2167_v39  ;;  %v2443_v39 = vld [vmem:[%s3663_s16 + $0x10] sm:$0xff]  ;;  %3011 = vmatprep.subr.bf16.mxu1 %v3010_v38 }
0x140e   :  { %v2166_v42 = vpop.xlane.xlu0 %2165 }
0x140f   :  { %3075 = vrsqrt.f32 %v2169_v40  ;;  %v2168_v43 = vmul.f32 0.03125, %v2166_v42  ;;  %v2444_v40 = vld [vmem:[%s3663_s16 + $0x18] sm:$0xff] }
0x1410   :  { %v3014_v42 = vpack.c.bf16 %v2444_v40, %v2443_v39 }
0x1411   :  { %v2170_v44 = vadd.f32 1e-12, %v2168_v43 }
0x1413   :  { %3077 = vrsqrt.f32 %v2170_v44 }
0x1419   :  { %v3076_v45 = vpop.eup %3075 }
0x141a   :  { %v2173_v47 = vmul.f32 %v3076_v45, %v2157_v27 }
0x141c   :  { %v2181_v50 = vmul.f32 %v2612_v46, %v2173_v47 }
0x141d   :  { %v3078_v51 = vpop.eup %3077 }
0x141e   :  { %v2174_v41 = vmul.f32 %v3078_v51, %v2158_v26  ;;  %v2189_v52 = vadd.f32 %v2613_v48, %v2181_v50  ;;  %v2636_v51 = vld [vmem:[%s3661_s14 + $0x1] ss:$0 sm:$0xff]  ;;  %s3123_s14 = smov [#allocation3]  }
0x1420   :  { %v2182_v53 = vmul.f32 %v2612_v46, %v2174_v41  ;;  %2897 = vmatprep.mubr.msk.f32.mxu1 %vm64_vm0, %v2189_v52 }
0x1422   :  { %v2190_v57 = vadd.f32 %v2613_v48, %v2182_v53 }
0x1424   :  { %2898 = vmatmul.mubr.msk.f32.vlgmr.msra.gmra.mrb[26].mxu1 %vm64_vm0, %v2190_v57 }
0x1425   :  { %3013 = vmatpush3.bf16.msra.mxu1 %v3010_v38 }
0x1426   :  { %3015 = vmatprep.subr.bf16.mxu1 %v3014_v42 }
0x1429   :  { %3017 = vmatpush3.bf16.msra.mxu1 %v3014_v42 }
0x14f7   :  { %v2899_v6 = vpop.f32.mrb[26].mxu1 }
0x14f8   :  { %v2282_v7 = vadd.f32 %v2899_v6, %v2619_v5  ;;  %v2276_v8 = vpop.f32.mrb[27].mxu1 }
0x14f9   :  { %v2277_v9 = vadd.f32 %v2619_v5, %v2276_v8 }
0x14fa   :  { %v2288_v10 = vmul.f32 0.70710677, %v2282_v7  ;;  %v2286_v17 = vmul.f32 0.5, %v2282_v7 }
0x14fb   :  { %v2287_v11 = vmul.f32 0.70710677, %v2277_v9  ;;  %v2285_v15 = vmul.f32 0.5, %v2277_v9 }
0x14fc   :  { %3079 = verf.f32 %v2288_v10 }
0x14fd   :  { %3081 = verf.f32 %v2287_v11 }
0x1506   :  { %v3080_v12 = vpop.eup %3079 }
0x1507   :  { %v3082_v13 = vpop.eup %3081  ;;  %v2292_v14 = vadd.f32 1.0, %v3080_v12 }
0x1508   :  { %v2291_v16 = vadd.f32 1.0, %v3082_v13 }
0x1509   :  { %v2294_v19 = vmul.f32 %v2292_v14, %v2286_v17 }
0x150a   :  { %v2293_v18 = vmul.f32 %v2291_v16, %v2285_v15 }
0x150c   :  { %2916 = vmatprep.mubr.msk.f32.mxu0 %vm1147_vm5, %v2293_v18 }
0x150d   :  { %2917 = vmatmul.mubr.msk.f32.vlgmr.msra.gmra.mrb[18].mxu0 %vm1147_vm5, %v2294_v19 }
0x15e0   :  { %v2918_v21 = vpop.f32.mrb[18].mxu0 }
0x15e1   :  { %v2390_v22 = vadd.f32 %v2918_v21, %v2631_v20  ;;  %v2384_v49 = vpop.f32.mrb[19].mxu0 }
0x15e2   :  { %v2385_v23 = vadd.f32 %v2631_v20, %v2384_v49 }
0x15e3   :  { %v2394_v35 = vadd.f32 %v2390_v22, %v2190_v57  ;;  %v2637_v57 = vld [vmem:[%s3662_s15 + $0x1] ss:$0 sm:$0xff]  ;;  %s2544_s15 = sshll.u32 %s3123_s14, 4  ;;  %s2545_s15 = int_to_ptr.vmem [resolvable:$true] %s2544_s15 }
0x15e4   :  { %v2393_v33 = vadd.f32 %v2385_v23, %v2189_v52  ;;  %s3091_s29 = scalar_lea.vmem %s2545_s15, 32  ;;  %p3096_p1 = scmp.lt.s32.totalorder %s2545_s15, %s2545_s15 }
0x15e5   :  { %v2402_v24 = vsel %vm64_vm0, %v2394_v35, 0.0  ;;  %p3092_p0 = scmp.ne.s32.totalorder %s2545_s15, %s3091_s29  ;;  %p3097_p2 = scmp.lt.s32.totalorder %s3091_s29, %s3091_s29 }
0x15e6   :  { %2403 = vadd.xlane.f32.xlu1 %v2402_v24  ;;  %v2399_v25 = vsel %vm64_vm0, %v2393_v33, 0.0 }
0x15e7   :  { %2400 = vadd.xlane.f32.xlu0 %v2399_v25  ;;  %p3098_p3 = por %p3097_p2, %p3096_p1 }
0x15e9   :  { %p3099_p4 = pnand %p3098_p3, %p3092_p0 }
0x1673   :  { %v2404_v26 = vpop.xlane.xlu1 %2403 }
0x1674   :  { %v2406_v27 = vmul.f32 0.03125, %v2404_v26  ;;  %v2401_v28 = vpop.xlane.xlu0 %2400 }
0x1675   :  { %v2405_v29 = vmul.f32 0.03125, %v2401_v28 }
0x1676   :  { %v2408_v30 = vsub.f32 %v2394_v35, %v2406_v27 }
0x1677   :  { %v2407_v55 = vsub.f32 %v2393_v33, %v2405_v29 }
0x1678   :  { %v2410_v54 = vmul.f32 %v2408_v30, %v2408_v30 }
0x1679   :  { %v2409_v31 = vmul.f32 %v2407_v55, %v2407_v55 }
0x167a   :  { %v2414_v32 = vsel %vm64_vm0, %v2410_v54, 0.0 }
0x167b   :  { %2415 = vadd.xlane.f32.xlu1 %v2414_v32  ;;  %v2411_v56 = vsel %vm64_vm0, %v2409_v31, 0.0 }
0x167c   :  { %2412 = vadd.xlane.f32.xlu0 %v2411_v56 }
0x1708   :  { %v2416_v43 = vpop.xlane.xlu1 %2415 }
0x1709   :  { %v2418_v44 = vmul.f32 0.03125, %v2416_v43  ;;  %v2413_v45 = vpop.xlane.xlu0 %2412 }
0x170a   :  { %v2417_v46 = vmul.f32 0.03125, %v2413_v45 }
0x170b   :  { %v2420_v47 = vadd.f32 1e-12, %v2418_v44 }
0x170c   :  { %v2419_v48 = vadd.f32 1e-12, %v2417_v46 }
0x170d   :  { %3083 = vrsqrt.f32 %v2420_v47 }
0x170e   :  { %3085 = vrsqrt.f32 %v2419_v48 }
0x1717   :  { %v3084_v50 = vpop.eup %3083 }
0x1718   :  { %v3086_v41 = vpop.eup %3085  ;;  %v2424_v52 = vmul.f32 %v3084_v50, %v2408_v30 }
0x1719   :  { %v2423_v53 = vmul.f32 %v3086_v41, %v2407_v55 }
0x171a   :  { %v2432_v58 = vmul.f32 %v2636_v51, %v2424_v52 }
0x171b   :  { %v2431_v59 = vmul.f32 %v2636_v51, %v2423_v53 }
0x171c   :  { %v2440_v61 = vadd.f32 %v2637_v57, %v2432_v58 }
0x171d   :  { %v2439_v60 = vadd.f32 %v2637_v57, %v2431_v59 }
0x171f   :  { %2927 = vmatprep.mubr.msk.f32.mxu1 %vm64_vm0, %v2439_v60 }
0x1720   :  { %2928 = vmatmul.mubr.msk.f32.vlgmr.msra.gmra.mrb[28].mxu1 %vm64_vm0, %v2440_v61 }
0x17f3   :  { %v2929_v63 = vpop.f32.mrb[28].mxu1 }
0x17f4   :  { %v2530_v0 = vadd.f32 %v2929_v63, %v2638_v62  ;;  %v2524_v1 = vpop.f32.mrb[29].mxu1 }
0x17f5   :  { %v2525_v2 = vadd.f32 %v2638_v62, %v2524_v1 }
0x17f6   :  { %3087 = vtanh.f32 %v2530_v0 }
0x17f7   :  { %3089 = vtanh.f32 %v2525_v2 }
0x1800   :  { %v3088_v3 = vpop.eup %3087 }
0x1801   :  { %v3090_v36 = vpop.eup %3089  ;;  %2537 = vst.msk [vmem:[#allocation3 + $0x1] sm:$0x1] %vm2535_vm6, %v3088_v3 }
0x1802   :  { %2536 = vst.msk [vmem:[#allocation3] sm:$0x1] %vm2535_vm6, %v3090_v36 }
0x1803   :  { %3102 = shalt.err (!%p3099_p4)
}
0x1804   :  { %s3103_s6 = scalar_lea.hbm %s3665_s18, 32 }
0x1805   :  { %p3104_p5 = scmp.ne.s32.totalorder %s3665_s18, %s3103_s6  ;;  %p3107_p6 = scmp.lt.u32.totalorder %s3103_s6, %s3665_s18 }
0x1807   :  { %p3109_p7 = pnand %p3107_p6, %p3104_p5 }
0x1809   :  { %3112 = shalt.err (!%p3109_p7)
}
0x180a   :  { %2547 = dma.vmem_to_hbm [thread:$0]  %s2545_s15, 32, %s3665_s18, [#allocation4]  }
0x180b   :  { %3113 = dma.done.wait [#allocation4], 32  }
0x180c   :  { %3114 = vsyncadd [#allocation4], 4294967264 }
0x180d   :  { %2551 = vsyncpa [#allocation4], 1 }

</bundles_post_ra>
